<compile_context>
chip_gen: v6e
topology: v6e:2x2x1
jax: 0.10.0
libtpu: 0.0.40
codegen_flags: <defaults>
</compile_context>

<pallas_src>
import jax
import jax.numpy as jnp
from jax.experimental import pallas as pl
from jax.experimental.pallas import tpu as pltpu

# ---------------- synthetic small config (DistilBERT-like) ----------------
VOCAB = 1000
MAX_POS = 64
HIDDEN = 128          # plays the role of preclass_dim (768 in the real model)
N_HEADS = 2
HEAD_DIM = HIDDEN // N_HEADS
FFN = 4 * HIDDEN
N_LAYERS = 2
SEQ = 8
BATCH = 2
NUM_CLASSES = 3
CLS_PAD = 128         # lane-dense padded logits width
LN_EPS = 1e-12


# ------------------------------ kernel -------------------------------------
def _layernorm(y, g, b):
    mu = jnp.mean(y, axis=-1, keepdims=True)
    var = jnp.mean((y - mu) ** 2, axis=-1, keepdims=True)
    return (y - mu) * jax.lax.rsqrt(var + LN_EPS) * g + b


def fused_kernel(x_ref, bias_ref, emb_g_ref, emb_b_ref,
                 wqkv_ref, bqkv_ref, wo_ref, bo_ref,
                 ln1g_ref, ln1b_ref,
                 w1_ref, b1_ref, w2_ref, b2_ref,
                 ln2g_ref, ln2b_ref,
                 pre_w_ref, pre_b_ref, cls_w_ref, cls_b_ref,
                 out_ref, x_sc):
    """One grid step == one transformer layer (weights streamed per layer)."""
    l = pl.program_id(0)

    @pl.when(l == 0)
    def _():
        # Embedding LayerNorm once, into the resident activation scratch.
        x_sc[...] = _layernorm(x_ref[...], emb_g_ref[...], emb_b_ref[...])
        out_ref[...] = jnp.zeros_like(out_ref)

    x = x_sc[...]                                   # (B*S, H) f32, residual stream
    x_bf = x.astype(jnp.bfloat16)
    bias = bias_ref[...]                            # (NH*B, 1, S) additive mask

    # ---------------- multi-head self-attention ----------------
    # One lane-concatenated projection for Q,K,V (Q pre-scaled by 1/sqrt(hd)).
    qkv = jnp.dot(x_bf, wqkv_ref[0],
                  preferred_element_type=jnp.float32) + bqkv_ref[0]   # (B*S, 3H)

    def split_heads(col0):
        # (B*S, H) column block -> (NH*B, S, HD), heads stacked on the batch axis.
        parts = [qkv[:, col0 + h * HEAD_DIM: col0 + (h + 1) * HEAD_DIM]
                 .reshape(BATCH, SEQ, HEAD_DIM) for h in range(N_HEADS)]
        return jnp.concatenate(parts, axis=0).astype(jnp.bfloat16)

    q = split_heads(0)
    k = split_heads(HIDDEN)
    v = split_heads(2 * HIDDEN)

    # Batched contractions over (head, batch) — no per-head matmul loop.
    s = jnp.einsum('bqd,bkd->bqk', q, k,
                   preferred_element_type=jnp.float32) + bias          # (NH*B,S,S)
    m = jnp.max(s, axis=-1, keepdims=True)
    e = jnp.exp(s - m)
    p = e * pl.reciprocal(jnp.sum(e, axis=-1, keepdims=True), approx=True)
    ctx = jnp.einsum('bqk,bkd->bqd', p.astype(jnp.bfloat16), v,
                     preferred_element_type=jnp.float32)               # (NH*B,S,HD)

    # Merge heads back into lanes and do ONE output projection (K = H).
    ctx = jnp.concatenate(
        [ctx[h * BATCH:(h + 1) * BATCH] for h in range(N_HEADS)],
        axis=-1).reshape(BATCH * SEQ, HIDDEN).astype(jnp.bfloat16)
    attn = jnp.dot(ctx, wo_ref[0],
                   preferred_element_type=jnp.float32) + bo_ref[0]

    y = _layernorm(attn + x, ln1g_ref[0], ln1b_ref[0])

    # ---------------------------- FFN ---------------------------
    h1 = jnp.dot(y.astype(jnp.bfloat16), w1_ref[0],
                 preferred_element_type=jnp.float32) + b1_ref[0]
    h1 = jax.nn.gelu(h1, approximate=True)  # TODO(synk): HF DistilBERT uses exact erf GELU
    h2 = jnp.dot(h1.astype(jnp.bfloat16), w2_ref[0],
                 preferred_element_type=jnp.float32) + b2_ref[0]
    x_new = _layernorm(h2 + y, ln2g_ref[0], ln2b_ref[0])
    x_sc[...] = x_new                                # carry residual to next layer

    # ----------------------- classifier head ------------------------
    @pl.when(l == pl.num_programs(0) - 1)
    def _():
        pooled = x_new.reshape(BATCH, SEQ, HIDDEN)[:, 0, :]            # (B, H)
        hh = jnp.dot(pooled.astype(jnp.bfloat16), pre_w_ref[...],
                     preferred_element_type=jnp.float32) + pre_b_ref[...]
        hh = jnp.maximum(hh, 0.0)                    # ReLU (dropout = identity)
        logits = jnp.dot(hh.astype(jnp.bfloat16), cls_w_ref[...],
                         preferred_element_type=jnp.float32) + cls_b_ref[...]
        out_ref[...] = logits.astype(out_ref.dtype)  # (B, CLS_PAD), lane-dense


# ------------------------------ wrapper -------------------------------------
def fused_forward_pallas(x_emb, mask_bias, params):
    args = (
        x_emb.reshape(BATCH * SEQ, HIDDEN), mask_bias,
        params["emb_ln_g"], params["emb_ln_b"],
        params["wqkv"], params["bqkv"], params["wo"], params["bo"],
        params["ln1_g"], params["ln1_b"],
        params["w1"], params["b1"], params["w2"], params["b2"],
        params["ln2_g"], params["ln2_b"],
        params["pre_w"], params["pre_b"], params["cls_w_pad"], params["cls_b_pad"],
    )
    per_layer_3d = lambda shape: pl.BlockSpec(shape, lambda l: (l, 0, 0))
    resident_2d = lambda shape: pl.BlockSpec(shape, lambda l: (0, 0))

    grid_spec = pltpu.PrefetchScalarGridSpec(
        num_scalar_prefetch=0,
        grid=(N_LAYERS,),
        in_specs=[
            resident_2d((BATCH * SEQ, HIDDEN)),                 # x (embeddings)
            pl.BlockSpec((N_HEADS * BATCH, 1, SEQ), lambda l: (0, 0, 0)),  # mask bias
            resident_2d((1, HIDDEN)),                           # emb_ln_g
            resident_2d((1, HIDDEN)),                           # emb_ln_b
            per_layer_3d((1, HIDDEN, 3 * HIDDEN)),              # wqkv  (bf16, streamed)
            per_layer_3d((1, 1, 3 * HIDDEN)),                   # bqkv
            per_layer_3d((1, HIDDEN, HIDDEN)),                  # wo
            per_layer_3d((1, 1, HIDDEN)),                       # bo
            per_layer_3d((1, 1, HIDDEN)),                       # ln1_g
            per_layer_3d((1, 1, HIDDEN)),                       # ln1_b
            per_layer_3d((1, HIDDEN, FFN)),                     # w1
            per_layer_3d((1, 1, FFN)),                          # b1
            per_layer_3d((1, FFN, HIDDEN)),                     # w2
            per_layer_3d((1, 1, HIDDEN)),                       # b2
            per_layer_3d((1, 1, HIDDEN)),                       # ln2_g
            per_layer_3d((1, 1, HIDDEN)),                       # ln2_b
            resident_2d((HIDDEN, HIDDEN)),                      # pre_w
            resident_2d((1, HIDDEN)),                           # pre_b
            resident_2d((HIDDEN, CLS_PAD)),                     # cls_w_pad
            resident_2d((1, CLS_PAD)),                          # cls_b_pad
        ],
        out_specs=pl.BlockSpec((BATCH, CLS_PAD), lambda l: (0, 0)),
        scratch_shapes=[pltpu.VMEM((BATCH * SEQ, HIDDEN), jnp.float32)],
    )
    logits_pad = pl.pallas_call(
        fused_kernel,
        out_shape=jax.ShapeDtypeStruct((BATCH, CLS_PAD), jnp.float32),
        grid_spec=grid_spec,
        compiler_params=pltpu.CompilerParams(
            dimension_semantics=("arbitrary",),      # layers are sequential
            vmem_limit_bytes=8 * 1024 * 1024,        # actual use < 2 MiB at this config
        ),
    )(*args)
    return logits_pad[:, :NUM_CLASSES]


# ------------------------------ model glue ----------------------------------
def init_params(key):
    def nrm(k, shape):
        return (0.02 * jax.random.normal(k, shape)).astype(jnp.float32)

    ks = jax.random.split(key, 8)

    # Fold the 1/sqrt(head_dim) attention scale into the Q projection
    # (one-time constant transform; kernel never multiplies by the scale).
    scale = 1.0 / float(HEAD_DIM) ** 0.5
    wqkv = nrm(ks[2], (N_LAYERS, HIDDEN, 3 * HIDDEN))
    bqkv = jnp.zeros((N_LAYERS, 1, 3 * HIDDEN), jnp.float32)
    wqkv = wqkv.at[:, :, :HIDDEN].multiply(scale)
    bqkv = bqkv.at[:, :, :HIDDEN].multiply(scale)

    # Lane-dense padded classifier weights, precomputed once.
    cls_w = nrm(ks[7], (HIDDEN, NUM_CLASSES))
    cls_b = jnp.zeros((1, NUM_CLASSES), jnp.float32)
    cls_w_pad = jnp.zeros((HIDDEN, CLS_PAD), jnp.float32).at[:, :NUM_CLASSES].set(cls_w)
    cls_b_pad = jnp.zeros((1, CLS_PAD), jnp.float32).at[:, :NUM_CLASSES].set(cls_b)

    params = {
        "word_emb": nrm(ks[0], (VOCAB, HIDDEN)),
        "pos_emb": nrm(ks[1], (MAX_POS, HIDDEN)),
        "emb_ln_g": jnp.ones((1, HIDDEN), jnp.float32),
        "emb_ln_b": jnp.zeros((1, HIDDEN), jnp.float32),
        # bf16 weight slabs: halve HBM->VMEM DMA, MXU-native on v6e/v7x.
        "wqkv": wqkv.astype(jnp.bfloat16),           # (L, H, 3H), Q pre-scaled
        "bqkv": bqkv,                                # f32 (added post-accumulation)
        "wo": nrm(ks[3], (N_LAYERS, HIDDEN, HIDDEN)).astype(jnp.bfloat16),
        "bo": jnp.zeros((N_LAYERS, 1, HIDDEN), jnp.float32),
        "ln1_g": jnp.ones((N_LAYERS, 1, HIDDEN), jnp.float32),
        "ln1_b": jnp.zeros((N_LAYERS, 1, HIDDEN), jnp.float32),
        "w1": nrm(ks[4], (N_LAYERS, HIDDEN, FFN)).astype(jnp.bfloat16),
        "b1": jnp.zeros((N_LAYERS, 1, FFN), jnp.float32),
        "w2": nrm(ks[5], (N_LAYERS, FFN, HIDDEN)).astype(jnp.bfloat16),
        "b2": jnp.zeros((N_LAYERS, 1, HIDDEN), jnp.float32),
        "ln2_g": jnp.ones((N_LAYERS, 1, HIDDEN), jnp.float32),
        "ln2_b": jnp.zeros((N_LAYERS, 1, HIDDEN), jnp.float32),
        "pre_w": nrm(ks[6], (HIDDEN, HIDDEN)).astype(jnp.bfloat16),
        "pre_b": jnp.zeros((1, HIDDEN), jnp.float32),
        "cls_w_pad": cls_w_pad.astype(jnp.bfloat16),
        "cls_b_pad": cls_b_pad,
    }
    return params


@jax.jit
def distilbert_classifier_forward(params, input_ids, attention_mask, token_type_ids):
    # token_type_ids accepted but unused — DistilBERT has no token-type embeddings.
    del token_type_ids
    B, S = input_ids.shape
    # TODO(synk): embedding gather stays in plain-JAX glue; could be fused via
    # PrefetchScalarGridSpec row gather to save one HBM round trip for x_emb.
    x = (params["word_emb"][input_ids]
         + params["pos_emb"][jnp.arange(S)][None, :, :]).astype(jnp.float32)
    # Additive attention-mask bias, tiled head-major to match the (NH*B, S, HD)
    # head stacking used inside the kernel.
    mask_bias = ((attention_mask.astype(jnp.float32) - 1.0) * 1e9).reshape(B, 1, S)
    mask_bias = jnp.tile(mask_bias, (N_HEADS, 1, 1))            # (NH*B, 1, S)
    return fused_forward_pallas(x, mask_bias, params)


if __name__ == "__main__":
    key = jax.random.PRNGKey(0)
    kp, kid = jax.random.split(key)
    params = init_params(kp)

    input_ids = jax.random.randint(kid, (BATCH, SEQ), 0, VOCAB, dtype=jnp.int32)
    attention_mask = jnp.array([[1, 1, 1, 1, 1, 1, 1, 1],
                                [1, 1, 1, 1, 1, 0, 0, 0]], dtype=jnp.int32)
    token_type_ids = jnp.zeros((BATCH, SEQ), dtype=jnp.int32)

    logits = distilbert_classifier_forward(params, input_ids, attention_mask,
                                           token_type_ids)
    logits = jax.block_until_ready(logits)
    assert logits.shape == (BATCH, NUM_CLASSES) and logits.dtype == jnp.float32
    assert bool(jnp.all(jnp.isfinite(logits)))
    print("KERNEL_OK")
</pallas_src>

<mosaic_0001>
module attributes {stable_mosaic.version = 11 : i64} {
  func.func @fused_kernel(%arg0: i32, %arg1: memref<16x128xf32, #tpu.memory_space<vmem>>, %arg2: memref<4x1x8xf32, #tpu.memory_space<vmem>>, %arg3: memref<1x128xf32, #tpu.memory_space<vmem>>, %arg4: memref<1x128xf32, #tpu.memory_space<vmem>>, %arg5: memref<1x128x384xbf16, #tpu.memory_space<vmem>>, %arg6: memref<1x1x384xf32, #tpu.memory_space<vmem>>, %arg7: memref<1x128x128xbf16, #tpu.memory_space<vmem>>, %arg8: memref<1x1x128xf32, #tpu.memory_space<vmem>>, %arg9: memref<1x1x128xf32, #tpu.memory_space<vmem>>, %arg10: memref<1x1x128xf32, #tpu.memory_space<vmem>>, %arg11: memref<1x128x512xbf16, #tpu.memory_space<vmem>>, %arg12: memref<1x1x512xf32, #tpu.memory_space<vmem>>, %arg13: memref<1x512x128xbf16, #tpu.memory_space<vmem>>, %arg14: memref<1x1x128xf32, #tpu.memory_space<vmem>>, %arg15: memref<1x1x128xf32, #tpu.memory_space<vmem>>, %arg16: memref<1x1x128xf32, #tpu.memory_space<vmem>>, %arg17: memref<128x128xbf16, #tpu.memory_space<vmem>>, %arg18: memref<1x128xf32, #tpu.memory_space<vmem>>, %arg19: memref<128x128xbf16, #tpu.memory_space<vmem>>, %arg20: memref<1x128xf32, #tpu.memory_space<vmem>>, %arg21: memref<2x128xf32, #tpu.memory_space<vmem>>, %arg22: memref<16x128xf32, #tpu.memory_space<vmem>>) attributes {dimension_semantics = [#tpu.dimension_semantics<arbitrary>], iteration_bounds = array<i64: 2>, scalar_prefetch = 0 : i64, scratch_operands = 1 : i64, tpu.core_type = #tpu.core_type<tc>, window_params = [{pipeline_mode = #tpu.pipeline_mode<synchronous>, transform_indices = @transform_0, window_bounds = array<i64: 16, 128>}, {pipeline_mode = #tpu.pipeline_mode<synchronous>, transform_indices = @transform_1, window_bounds = array<i64: 4, 1, 8>}, {pipeline_mode = #tpu.pipeline_mode<synchronous>, transform_indices = @transform_2, window_bounds = array<i64: 1, 128>}, {pipeline_mode = #tpu.pipeline_mode<synchronous>, transform_indices = @transform_3, window_bounds = array<i64: 1, 128>}, {transform_indices = @transform_4, window_bounds = array<i64: 1, 128, 384>}, {transform_indices = @transform_5, window_bounds = array<i64: 1, 1, 384>}, {transform_indices = @transform_6, window_bounds = array<i64: 1, 128, 128>}, {transform_indices = @transform_7, window_bounds = array<i64: 1, 1, 128>}, {transform_indices = @transform_8, window_bounds = array<i64: 1, 1, 128>}, {transform_indices = @transform_9, window_bounds = array<i64: 1, 1, 128>}, {transform_indices = @transform_10, window_bounds = array<i64: 1, 128, 512>}, {transform_indices = @transform_11, window_bounds = array<i64: 1, 1, 512>}, {transform_indices = @transform_12, window_bounds = array<i64: 1, 512, 128>}, {transform_indices = @transform_13, window_bounds = array<i64: 1, 1, 128>}, {transform_indices = @transform_14, window_bounds = array<i64: 1, 1, 128>}, {transform_indices = @transform_15, window_bounds = array<i64: 1, 1, 128>}, {pipeline_mode = #tpu.pipeline_mode<synchronous>, transform_indices = @transform_16, window_bounds = array<i64: 128, 128>}, {pipeline_mode = #tpu.pipeline_mode<synchronous>, transform_indices = @transform_17, window_bounds = array<i64: 1, 128>}, {pipeline_mode = #tpu.pipeline_mode<synchronous>, transform_indices = @transform_18, window_bounds = array<i64: 128, 128>}, {pipeline_mode = #tpu.pipeline_mode<synchronous>, transform_indices = @transform_19, window_bounds = array<i64: 1, 128>}, {pipeline_mode = #tpu.pipeline_mode<synchronous>, transform_indices = @transform_20, window_bounds = array<i64: 2, 128>}]} {
    %c0_i32 = arith.constant 0 : i32
    %0 = arith.cmpi eq, %arg0, %c0_i32 : i32
    %1 = arith.extui %0 : i1 to i32
    %c0_i32_0 = arith.constant 0 : i32
    %2 = arith.cmpi ne, %1, %c0_i32_0 : i32
    scf.if %2 {
      %c0_65 = arith.constant 0 : index
      %c0_66 = arith.constant 0 : index
      %145 = vector.load %arg1[%c0_65, %c0_66] : memref<16x128xf32, #tpu.memory_space<vmem>>, vector<16x128xf32>
      %c0_67 = arith.constant 0 : index
      %c0_68 = arith.constant 0 : index
      %146 = vector.load %arg3[%c0_67, %c0_68] : memref<1x128xf32, #tpu.memory_space<vmem>>, vector<1x128xf32>
      %c0_69 = arith.constant 0 : index
      %c0_70 = arith.constant 0 : index
      %147 = vector.load %arg4[%c0_69, %c0_70] : memref<1x128xf32, #tpu.memory_space<vmem>>, vector<1x128xf32>
      %cst_71 = arith.constant dense<0.000000e+00> : vector<16xf32>
      %148 = vector.multi_reduction <add>, %145, %cst_71 [1] : vector<16x128xf32> to vector<16xf32>
      %149 = vector.shape_cast %148 : vector<16xf32> to vector<16x1xf32>
      %cst_72 = arith.constant 1.280000e+02 : f32
      %150 = vector.broadcast %cst_72 : f32 to vector<16x1xf32>
      %151 = arith.divf %149, %150 : vector<16x1xf32>
      %152 = vector.broadcast %151 : vector<16x1xf32> to vector<16x128xf32>
      %153 = arith.subf %145, %152 : vector<16x128xf32>
      %154 = arith.mulf %153, %153 : vector<16x128xf32>
      %cst_73 = arith.constant dense<0.000000e+00> : vector<16xf32>
      %155 = vector.multi_reduction <add>, %154, %cst_73 [1] : vector<16x128xf32> to vector<16xf32>
      %156 = vector.shape_cast %155 : vector<16xf32> to vector<16x1xf32>
      %cst_74 = arith.constant 1.280000e+02 : f32
      %157 = vector.broadcast %cst_74 : f32 to vector<16x1xf32>
      %158 = arith.divf %156, %157 : vector<16x1xf32>
      %159 = vector.broadcast %151 : vector<16x1xf32> to vector<16x128xf32>
      %160 = arith.subf %145, %159 : vector<16x128xf32>
      %cst_75 = arith.constant 9.99999996E-13 : f32
      %161 = vector.broadcast %cst_75 : f32 to vector<16x1xf32>
      %162 = arith.addf %158, %161 : vector<16x1xf32>
      %163 = math.rsqrt %162 : vector<16x1xf32>
      %164 = vector.broadcast %163 : vector<16x1xf32> to vector<16x128xf32>
      %165 = arith.mulf %160, %164 : vector<16x128xf32>
      %166 = vector.broadcast %146 : vector<1x128xf32> to vector<16x128xf32>
      %167 = arith.mulf %165, %166 : vector<16x128xf32>
      %168 = vector.broadcast %147 : vector<1x128xf32> to vector<16x128xf32>
      %169 = arith.addf %167, %168 : vector<16x128xf32>
      %c0_76 = arith.constant 0 : index
      %c0_77 = arith.constant 0 : index
      %170 = vector.load %arg22[%c0_76, %c0_77] : memref<16x128xf32, #tpu.memory_space<vmem>>, vector<16x128xf32>
      tpu.vector_store %arg22[%c0_76, %c0_77], %169 {strides = array<i32>} : memref<16x128xf32, #tpu.memory_space<vmem>>, vector<16x128xf32>,
      %cst_78 = arith.constant 0.000000e+00 : f32
      %171 = vector.broadcast %cst_78 : f32 to vector<2x128xf32>
      %c0_79 = arith.constant 0 : index
      %c0_80 = arith.constant 0 : index
      %172 = vector.load %arg21[%c0_79, %c0_80] : memref<2x128xf32, #tpu.memory_space<vmem>>, vector<2x128xf32>
      tpu.vector_store %arg21[%c0_79, %c0_80], %171 {strides = array<i32>} : memref<2x128xf32, #tpu.memory_space<vmem>>, vector<2x128xf32>,
    } else {
    }
    %c0 = arith.constant 0 : index
    %c0_1 = arith.constant 0 : index
    %3 = vector.load %arg22[%c0, %c0_1] : memref<16x128xf32, #tpu.memory_space<vmem>>, vector<16x128xf32>
    %4 = arith.truncf %3 : vector<16x128xf32> to vector<16x128xbf16>
    %c0_2 = arith.constant 0 : index
    %c0_3 = arith.constant 0 : index
    %c0_4 = arith.constant 0 : index
    %5 = vector.load %arg2[%c0_2, %c0_3, %c0_4] : memref<4x1x8xf32, #tpu.memory_space<vmem>>, vector<4x1x8xf32>
    %c0_5 = arith.constant 0 : index
    %c0_6 = arith.constant 0 : index
    %c0_7 = arith.constant 0 : index
    %6 = vector.load %arg5[%c0_5, %c0_6, %c0_7] : memref<1x128x384xbf16, #tpu.memory_space<vmem>>, vector<1x128x384xbf16>
    %7 = vector.shape_cast %6 : vector<1x128x384xbf16> to vector<128x384xbf16>
    %cst = arith.constant dense<0.000000e+00> : vector<16x384xf32>
    %8 = tpu.matmul %4, %7, %cst {dimension_numbers = #tpu.dot_dimension_numbers<[1], [0], [0], [1], [0, 0, 1, 1], [], []>} : vector<16x128xbf16>, vector<128x384xbf16>, vector<16x384xf32> -> vector<16x384xf32>
    %c0_8 = arith.constant 0 : index
    %c0_9 = arith.constant 0 : index
    %c0_10 = arith.constant 0 : index
    %9 = vector.load %arg6[%c0_8, %c0_9, %c0_10] : memref<1x1x384xf32, #tpu.memory_space<vmem>>, vector<1x1x384xf32>
    %10 = vector.shape_cast %9 : vector<1x1x384xf32> to vector<1x384xf32>
    %11 = vector.broadcast %10 : vector<1x384xf32> to vector<16x384xf32>
    %12 = arith.addf %8, %11 : vector<16x384xf32>
    %13 = vector.extract_strided_slice %12 {offsets = [0, 0], sizes = [16, 64], strides = [1, 1]} : vector<16x384xf32> to vector<16x64xf32>
    %14 = vector.shape_cast %13 : vector<16x64xf32> to vector<2x8x64xf32>
    %15 = vector.extract_strided_slice %12 {offsets = [0, 64], sizes = [16, 64], strides = [1, 1]} : vector<16x384xf32> to vector<16x64xf32>
    %16 = vector.shape_cast %15 : vector<16x64xf32> to vector<2x8x64xf32>
    %17 = tpu.concatenate %14, %16 in 0 : vector<2x8x64xf32>, vector<2x8x64xf32> -> vector<4x8x64xf32>
    %18 = arith.truncf %17 : vector<4x8x64xf32> to vector<4x8x64xbf16>
    %19 = vector.extract_strided_slice %12 {offsets = [0, 128], sizes = [16, 64], strides = [1, 1]} : vector<16x384xf32> to vector<16x64xf32>
    %20 = vector.shape_cast %19 : vector<16x64xf32> to vector<2x8x64xf32>
    %21 = vector.extract_strided_slice %12 {offsets = [0, 192], sizes = [16, 64], strides = [1, 1]} : vector<16x384xf32> to vector<16x64xf32>
    %22 = vector.shape_cast %21 : vector<16x64xf32> to vector<2x8x64xf32>
    %23 = tpu.concatenate %20, %22 in 0 : vector<2x8x64xf32>, vector<2x8x64xf32> -> vector<4x8x64xf32>
    %24 = arith.truncf %23 : vector<4x8x64xf32> to vector<4x8x64xbf16>
    %25 = vector.extract_strided_slice %12 {offsets = [0, 256], sizes = [16, 64], strides = [1, 1]} : vector<16x384xf32> to vector<16x64xf32>
    %26 = vector.shape_cast %25 : vector<16x64xf32> to vector<2x8x64xf32>
    %27 = vector.extract_strided_slice %12 {offsets = [0, 320], sizes = [16, 64], strides = [1, 1]} : vector<16x384xf32> to vector<16x64xf32>
    %28 = vector.shape_cast %27 : vector<16x64xf32> to vector<2x8x64xf32>
    %29 = tpu.concatenate %26, %28 in 0 : vector<2x8x64xf32>, vector<2x8x64xf32> -> vector<4x8x64xf32>
    %30 = arith.truncf %29 : vector<4x8x64xf32> to vector<4x8x64xbf16>
    "tpu.trace_start"() <{level = 10 : i32, message = "bqd,bkd->bqk"}> : () -> ()
    %cst_11 = arith.constant dense<0.000000e+00> : vector<4x8x8xf32>
    %31 = tpu.matmul %18, %24, %cst_11 {dimension_numbers = #tpu.dot_dimension_numbers<[2], [2], [1], [1], [0, 0, 0, 1, 1, 1], [0], [0]>} : vector<4x8x64xbf16>, vector<4x8x64xbf16>, vector<4x8x8xf32> -> vector<4x8x8xf32>
    "tpu.trace_stop"() : () -> ()
    %32 = vector.broadcast %5 : vector<4x1x8xf32> to vector<4x8x8xf32>
    %33 = arith.addf %31, %32 : vector<4x8x8xf32>
    %cst_12 = arith.constant dense<0xFF800000> : vector<4x8xf32>
    %34 = vector.multi_reduction <maximumf>, %33, %cst_12 [2] : vector<4x8x8xf32> to vector<4x8xf32>
    %35 = vector.shape_cast %34 : vector<4x8xf32> to vector<4x8x1xf32>
    %36 = vector.broadcast %35 : vector<4x8x1xf32> to vector<4x8x8xf32>
    %37 = arith.subf %33, %36 : vector<4x8x8xf32>
    %38 = math.exp %37 : vector<4x8x8xf32>
    %cst_13 = arith.constant dense<0.000000e+00> : vector<4x8xf32>
    %39 = vector.multi_reduction <add>, %38, %cst_13 [2] : vector<4x8x8xf32> to vector<4x8xf32>
    %40 = vector.shape_cast %39 : vector<4x8xf32> to vector<4x8x1xf32>
    %41 = tpu.reciprocal %40 {approx = true} : vector<4x8x1xf32> -> vector<4x8x1xf32>
    %42 = vector.broadcast %41 : vector<4x8x1xf32> to vector<4x8x8xf32>
    %43 = arith.mulf %38, %42 : vector<4x8x8xf32>
    %44 = arith.truncf %43 : vector<4x8x8xf32> to vector<4x8x8xbf16>
    "tpu.trace_start"() <{level = 10 : i32, message = "bqk,bkd->bqd"}> : () -> ()
    %cst_14 = arith.constant dense<0.000000e+00> : vector<4x8x64xf32>
    %45 = tpu.matmul %44, %30, %cst_14 {dimension_numbers = #tpu.dot_dimension_numbers<[2], [1], [1], [2], [0, 0, 0, 1, 1, 2], [0], [0]>} : vector<4x8x8xbf16>, vector<4x8x64xbf16>, vector<4x8x64xf32> -> vector<4x8x64xf32>
    "tpu.trace_stop"() : () -> ()
    %46 = vector.extract_strided_slice %45 {offsets = [0, 0, 0], sizes = [2, 8, 64], strides = [1, 1, 1]} : vector<4x8x64xf32> to vector<2x8x64xf32>
    %47 = vector.extract_strided_slice %45 {offsets = [2, 0, 0], sizes = [2, 8, 64], strides = [1, 1, 1]} : vector<4x8x64xf32> to vector<2x8x64xf32>
    %48 = tpu.concatenate %46, %47 in 2 : vector<2x8x64xf32>, vector<2x8x64xf32> -> vector<2x8x128xf32>
    %49 = vector.shape_cast %48 : vector<2x8x128xf32> to vector<16x128xf32>
    %50 = arith.truncf %49 : vector<16x128xf32> to vector<16x128xbf16>
    %c0_15 = arith.constant 0 : index
    %c0_16 = arith.constant 0 : index
    %c0_17 = arith.constant 0 : index
    %51 = vector.load %arg7[%c0_15, %c0_16, %c0_17] : memref<1x128x128xbf16, #tpu.memory_space<vmem>>, vector<1x128x128xbf16>
    %52 = vector.shape_cast %51 : vector<1x128x128xbf16> to vector<128x128xbf16>
    %cst_18 = arith.constant dense<0.000000e+00> : vector<16x128xf32>
    %53 = tpu.matmul %50, %52, %cst_18 {dimension_numbers = #tpu.dot_dimension_numbers<[1], [0], [0], [1], [0, 0, 1, 1], [], []>} : vector<16x128xbf16>, vector<128x128xbf16>, vector<16x128xf32> -> vector<16x128xf32>
    %c0_19 = arith.constant 0 : index
    %c0_20 = arith.constant 0 : index
    %c0_21 = arith.constant 0 : index
    %54 = vector.load %arg8[%c0_19, %c0_20, %c0_21] : memref<1x1x128xf32, #tpu.memory_space<vmem>>, vector<1x1x128xf32>
    %55 = vector.shape_cast %54 : vector<1x1x128xf32> to vector<1x128xf32>
    %56 = vector.broadcast %55 : vector<1x128xf32> to vector<16x128xf32>
    %57 = arith.addf %53, %56 : vector<16x128xf32>
    %58 = arith.addf %57, %3 : vector<16x128xf32>
    %c0_22 = arith.constant 0 : index
    %c0_23 = arith.constant 0 : index
    %c0_24 = arith.constant 0 : index
    %59 = vector.load %arg9[%c0_22, %c0_23, %c0_24] : memref<1x1x128xf32, #tpu.memory_space<vmem>>, vector<1x1x128xf32>
    %60 = vector.shape_cast %59 : vector<1x1x128xf32> to vector<1x128xf32>
    %c0_25 = arith.constant 0 : index
    %c0_26 = arith.constant 0 : index
    %c0_27 = arith.constant 0 : index
    %61 = vector.load %arg10[%c0_25, %c0_26, %c0_27] : memref<1x1x128xf32, #tpu.memory_space<vmem>>, vector<1x1x128xf32>
    %62 = vector.shape_cast %61 : vector<1x1x128xf32> to vector<1x128xf32>
    %cst_28 = arith.constant dense<0.000000e+00> : vector<16xf32>
    %63 = vector.multi_reduction <add>, %58, %cst_28 [1] : vector<16x128xf32> to vector<16xf32>
    %64 = vector.shape_cast %63 : vector<16xf32> to vector<16x1xf32>
    %cst_29 = arith.constant 1.280000e+02 : f32
    %65 = vector.broadcast %cst_29 : f32 to vector<16x1xf32>
    %66 = arith.divf %64, %65 : vector<16x1xf32>
    %67 = vector.broadcast %66 : vector<16x1xf32> to vector<16x128xf32>
    %68 = arith.subf %58, %67 : vector<16x128xf32>
    %69 = arith.mulf %68, %68 : vector<16x128xf32>
    %cst_30 = arith.constant dense<0.000000e+00> : vector<16xf32>
    %70 = vector.multi_reduction <add>, %69, %cst_30 [1] : vector<16x128xf32> to vector<16xf32>
    %71 = vector.shape_cast %70 : vector<16xf32> to vector<16x1xf32>
    %cst_31 = arith.constant 1.280000e+02 : f32
    %72 = vector.broadcast %cst_31 : f32 to vector<16x1xf32>
    %73 = arith.divf %71, %72 : vector<16x1xf32>
    %74 = vector.broadcast %66 : vector<16x1xf32> to vector<16x128xf32>
    %75 = arith.subf %58, %74 : vector<16x128xf32>
    %cst_32 = arith.constant 9.99999996E-13 : f32
    %76 = vector.broadcast %cst_32 : f32 to vector<16x1xf32>
    %77 = arith.addf %73, %76 : vector<16x1xf32>
    %78 = math.rsqrt %77 : vector<16x1xf32>
    %79 = vector.broadcast %78 : vector<16x1xf32> to vector<16x128xf32>
    %80 = arith.mulf %75, %79 : vector<16x128xf32>
    %81 = vector.broadcast %60 : vector<1x128xf32> to vector<16x128xf32>
    %82 = arith.mulf %80, %81 : vector<16x128xf32>
    %83 = vector.broadcast %62 : vector<1x128xf32> to vector<16x128xf32>
    %84 = arith.addf %82, %83 : vector<16x128xf32>
    %85 = arith.truncf %84 : vector<16x128xf32> to vector<16x128xbf16>
    %c0_33 = arith.constant 0 : index
    %c0_34 = arith.constant 0 : index
    %c0_35 = arith.constant 0 : index
    %86 = vector.load %arg11[%c0_33, %c0_34, %c0_35] : memref<1x128x512xbf16, #tpu.memory_space<vmem>>, vector<1x128x512xbf16>
    %87 = vector.shape_cast %86 : vector<1x128x512xbf16> to vector<128x512xbf16>
    %cst_36 = arith.constant dense<0.000000e+00> : vector<16x512xf32>
    %88 = tpu.matmul %85, %87, %cst_36 {dimension_numbers = #tpu.dot_dimension_numbers<[1], [0], [0], [1], [0, 0, 1, 1], [], []>} : vector<16x128xbf16>, vector<128x512xbf16>, vector<16x512xf32> -> vector<16x512xf32>
    %c0_37 = arith.constant 0 : index
    %c0_38 = arith.constant 0 : index
    %c0_39 = arith.constant 0 : index
    %89 = vector.load %arg12[%c0_37, %c0_38, %c0_39] : memref<1x1x512xf32, #tpu.memory_space<vmem>>, vector<1x1x512xf32>
    %90 = vector.shape_cast %89 : vector<1x1x512xf32> to vector<1x512xf32>
    %91 = vector.broadcast %90 : vector<1x512xf32> to vector<16x512xf32>
    %92 = arith.addf %88, %91 : vector<16x512xf32>
    %93 = arith.mulf %92, %92 : vector<16x512xf32>
    %94 = arith.mulf %92, %93 : vector<16x512xf32>
    %cst_40 = arith.constant 4.471500e-02 : f32
    %95 = vector.broadcast %cst_40 : f32 to vector<16x512xf32>
    %96 = arith.mulf %95, %94 : vector<16x512xf32>
    %97 = arith.addf %92, %96 : vector<16x512xf32>
    %cst_41 = arith.constant 0.797884583 : f32
    %98 = vector.broadcast %cst_41 : f32 to vector<16x512xf32>
    %99 = arith.mulf %98, %97 : vector<16x512xf32>
    %100 = math.tanh %99 : vector<16x512xf32>
    %cst_42 = arith.constant 1.000000e+00 : f32
    %101 = vector.broadcast %cst_42 : f32 to vector<16x512xf32>
    %102 = arith.addf %101, %100 : vector<16x512xf32>
    %cst_43 = arith.constant 5.000000e-01 : f32
    %103 = vector.broadcast %cst_43 : f32 to vector<16x512xf32>
    %104 = arith.mulf %103, %102 : vector<16x512xf32>
    %105 = arith.mulf %92, %104 : vector<16x512xf32>
    %106 = arith.truncf %105 : vector<16x512xf32> to vector<16x512xbf16>
    %c0_44 = arith.constant 0 : index
    %c0_45 = arith.constant 0 : index
    %c0_46 = arith.constant 0 : index
    %107 = vector.load %arg13[%c0_44, %c0_45, %c0_46] : memref<1x512x128xbf16, #tpu.memory_space<vmem>>, vector<1x512x128xbf16>
    %108 = vector.shape_cast %107 : vector<1x512x128xbf16> to vector<512x128xbf16>
    %cst_47 = arith.constant dense<0.000000e+00> : vector<16x128xf32>
    %109 = tpu.matmul %106, %108, %cst_47 {dimension_numbers = #tpu.dot_dimension_numbers<[1], [0], [0], [1], [0, 0, 1, 1], [], []>} : vector<16x512xbf16>, vector<512x128xbf16>, vector<16x128xf32> -> vector<16x128xf32>
    %c0_48 = arith.constant 0 : index
    %c0_49 = arith.constant 0 : index
    %c0_50 = arith.constant 0 : index
    %110 = vector.load %arg14[%c0_48, %c0_49, %c0_50] : memref<1x1x128xf32, #tpu.memory_space<vmem>>, vector<1x1x128xf32>
    %111 = vector.shape_cast %110 : vector<1x1x128xf32> to vector<1x128xf32>
    %112 = vector.broadcast %111 : vector<1x128xf32> to vector<16x128xf32>
    %113 = arith.addf %109, %112 : vector<16x128xf32>
    %114 = arith.addf %113, %84 : vector<16x128xf32>
    %c0_51 = arith.constant 0 : index
    %c0_52 = arith.constant 0 : index
    %c0_53 = arith.constant 0 : index
    %115 = vector.load %arg15[%c0_51, %c0_52, %c0_53] : memref<1x1x128xf32, #tpu.memory_space<vmem>>, vector<1x1x128xf32>
    %116 = vector.shape_cast %115 : vector<1x1x128xf32> to vector<1x128xf32>
    %c0_54 = arith.constant 0 : index
    %c0_55 = arith.constant 0 : index
    %c0_56 = arith.constant 0 : index
    %117 = vector.load %arg16[%c0_54, %c0_55, %c0_56] : memref<1x1x128xf32, #tpu.memory_space<vmem>>, vector<1x1x128xf32>
    %118 = vector.shape_cast %117 : vector<1x1x128xf32> to vector<1x128xf32>
    %cst_57 = arith.constant dense<0.000000e+00> : vector<16xf32>
    %119 = vector.multi_reduction <add>, %114, %cst_57 [1] : vector<16x128xf32> to vector<16xf32>
    %120 = vector.shape_cast %119 : vector<16xf32> to vector<16x1xf32>
    %cst_58 = arith.constant 1.280000e+02 : f32
    %121 = vector.broadcast %cst_58 : f32 to vector<16x1xf32>
    %122 = arith.divf %120, %121 : vector<16x1xf32>
    %123 = vector.broadcast %122 : vector<16x1xf32> to vector<16x128xf32>
    %124 = arith.subf %114, %123 : vector<16x128xf32>
    %125 = arith.mulf %124, %124 : vector<16x128xf32>
    %cst_59 = arith.constant dense<0.000000e+00> : vector<16xf32>
    %126 = vector.multi_reduction <add>, %125, %cst_59 [1] : vector<16x128xf32> to vector<16xf32>
    %127 = vector.shape_cast %126 : vector<16xf32> to vector<16x1xf32>
    %cst_60 = arith.constant 1.280000e+02 : f32
    %128 = vector.broadcast %cst_60 : f32 to vector<16x1xf32>
    %129 = arith.divf %127, %128 : vector<16x1xf32>
    %130 = vector.broadcast %122 : vector<16x1xf32> to vector<16x128xf32>
    %131 = arith.subf %114, %130 : vector<16x128xf32>
    %cst_61 = arith.constant 9.99999996E-13 : f32
    %132 = vector.broadcast %cst_61 : f32 to vector<16x1xf32>
    %133 = arith.addf %129, %132 : vector<16x1xf32>
    %134 = math.rsqrt %133 : vector<16x1xf32>
    %135 = vector.broadcast %134 : vector<16x1xf32> to vector<16x128xf32>
    %136 = arith.mulf %131, %135 : vector<16x128xf32>
    %137 = vector.broadcast %116 : vector<1x128xf32> to vector<16x128xf32>
    %138 = arith.mulf %136, %137 : vector<16x128xf32>
    %139 = vector.broadcast %118 : vector<1x128xf32> to vector<16x128xf32>
    %140 = arith.addf %138, %139 : vector<16x128xf32>
    %c0_62 = arith.constant 0 : index
    %c0_63 = arith.constant 0 : index
    %141 = vector.load %arg22[%c0_62, %c0_63] : memref<16x128xf32, #tpu.memory_space<vmem>>, vector<16x128xf32>
    tpu.vector_store %arg22[%c0_62, %c0_63], %140 {strides = array<i32>} : memref<16x128xf32, #tpu.memory_space<vmem>>, vector<16x128xf32>,
    %c1_i32 = arith.constant 1 : i32
    %142 = arith.cmpi eq, %arg0, %c1_i32 : i32
    %143 = arith.extui %142 : i1 to i32
    %c0_i32_64 = arith.constant 0 : i32
    %144 = arith.cmpi ne, %143, %c0_i32_64 : i32
    scf.if %144 {
      %145 = vector.shape_cast %140 : vector<16x128xf32> to vector<2x8x128xf32>
      %146 = vector.extract_strided_slice %145 {offsets = [0, 0, 0], sizes = [2, 1, 128], strides = [1, 1, 1]} : vector<2x8x128xf32> to vector<2x1x128xf32>
      %147 = vector.shape_cast %146 : vector<2x1x128xf32> to vector<2x128xf32>
      %148 = arith.truncf %147 : vector<2x128xf32> to vector<2x128xbf16>
      %c0_65 = arith.constant 0 : index
      %c0_66 = arith.constant 0 : index
      %149 = vector.load %arg17[%c0_65, %c0_66] : memref<128x128xbf16, #tpu.memory_space<vmem>>, vector<128x128xbf16>
      %cst_67 = arith.constant dense<0.000000e+00> : vector<2x128xf32>
      %150 = tpu.matmul %148, %149, %cst_67 {dimension_numbers = #tpu.dot_dimension_numbers<[1], [0], [0], [1], [0, 0, 1, 1], [], []>} : vector<2x128xbf16>, vector<128x128xbf16>, vector<2x128xf32> -> vector<2x128xf32>
      %c0_68 = arith.constant 0 : index
      %c0_69 = arith.constant 0 : index
      %151 = vector.load %arg18[%c0_68, %c0_69] : memref<1x128xf32, #tpu.memory_space<vmem>>, vector<1x128xf32>
      %152 = vector.broadcast %151 : vector<1x128xf32> to vector<2x128xf32>
      %153 = arith.addf %150, %152 : vector<2x128xf32>
      %cst_70 = arith.constant 0.000000e+00 : f32
      %154 = vector.broadcast %cst_70 : f32 to vector<2x128xf32>
      %155 = arith.maximumf %153, %154 : vector<2x128xf32>
      %156 = arith.truncf %155 : vector<2x128xf32> to vector<2x128xbf16>
      %c0_71 = arith.constant 0 : index
      %c0_72 = arith.constant 0 : index
      %157 = vector.load %arg19[%c0_71, %c0_72] : memref<128x128xbf16, #tpu.memory_space<vmem>>, vector<128x128xbf16>
      %cst_73 = arith.constant dense<0.000000e+00> : vector<2x128xf32>
      %158 = tpu.matmul %156, %157, %cst_73 {dimension_numbers = #tpu.dot_dimension_numbers<[1], [0], [0], [1], [0, 0, 1, 1], [], []>} : vector<2x128xbf16>, vector<128x128xbf16>, vector<2x128xf32> -> vector<2x128xf32>
      %c0_74 = arith.constant 0 : index
      %c0_75 = arith.constant 0 : index
      %159 = vector.load %arg20[%c0_74, %c0_75] : memref<1x128xf32, #tpu.memory_space<vmem>>, vector<1x128xf32>
      %160 = vector.broadcast %159 : vector<1x128xf32> to vector<2x128xf32>
      %161 = arith.addf %158, %160 : vector<2x128xf32>
      %c0_76 = arith.constant 0 : index
      %c0_77 = arith.constant 0 : index
      %162 = vector.load %arg21[%c0_76, %c0_77] : memref<2x128xf32, #tpu.memory_space<vmem>>, vector<2x128xf32>
      tpu.vector_store %arg21[%c0_76, %c0_77], %161 {strides = array<i32>} : memref<2x128xf32, #tpu.memory_space<vmem>>, vector<2x128xf32>,
    } else {
    }
    return
  }
  func.func @transform_0(%arg0: i32) -> (i32, i32) {
    %c0_i32 = arith.constant 0 : i32
    %c0_i32_0 = arith.constant 0 : i32
    %c0_i32_1 = arith.constant 0 : i32
    return %c0_i32, %c0_i32_0 : i32, i32
  }
  func.func @transform_1(%arg0: i32) -> (i32, i32, i32) {
    %c0_i32 = arith.constant 0 : i32
    %c0_i32_0 = arith.constant 0 : i32
    %c0_i32_1 = arith.constant 0 : i32
    %c0_i32_2 = arith.constant 0 : i32
    return %c0_i32, %c0_i32_0, %c0_i32_1 : i32, i32, i32
  }
  func.func @transform_2(%arg0: i32) -> (i32, i32) {
    %c0_i32 = arith.constant 0 : i32
    %c0_i32_0 = arith.constant 0 : i32
    %c0_i32_1 = arith.constant 0 : i32
    return %c0_i32, %c0_i32_0 : i32, i32
  }
  func.func @transform_3(%arg0: i32) -> (i32, i32) {
    %c0_i32 = arith.constant 0 : i32
    %c0_i32_0 = arith.constant 0 : i32
    %c0_i32_1 = arith.constant 0 : i32
    return %c0_i32, %c0_i32_0 : i32, i32
  }
  func.func @transform_4(%arg0: i32) -> (i32, i32, i32) {
    %c0_i32 = arith.constant 0 : i32
    %c0_i32_0 = arith.constant 0 : i32
    %c0_i32_1 = arith.constant 0 : i32
    return %arg0, %c0_i32, %c0_i32_0 : i32, i32, i32
  }
  func.func @transform_5(%arg0: i32) -> (i32, i32, i32) {
    %c0_i32 = arith.constant 0 : i32
    %c0_i32_0 = arith.constant 0 : i32
    %c0_i32_1 = arith.constant 0 : i32
    return %arg0, %c0_i32, %c0_i32_0 : i32, i32, i32
  }
  func.func @transform_6(%arg0: i32) -> (i32, i32, i32) {
    %c0_i32 = arith.constant 0 : i32
    %c0_i32_0 = arith.constant 0 : i32
    %c0_i32_1 = arith.constant 0 : i32
    return %arg0, %c0_i32, %c0_i32_0 : i32, i32, i32
  }
  func.func @transform_7(%arg0: i32) -> (i32, i32, i32) {
    %c0_i32 = arith.constant 0 : i32
    %c0_i32_0 = arith.constant 0 : i32
    %c0_i32_1 = arith.constant 0 : i32
    return %arg0, %c0_i32, %c0_i32_0 : i32, i32, i32
  }
  func.func @transform_8(%arg0: i32) -> (i32, i32, i32) {
    %c0_i32 = arith.constant 0 : i32
    %c0_i32_0 = arith.constant 0 : i32
    %c0_i32_1 = arith.constant 0 : i32
    return %arg0, %c0_i32, %c0_i32_0 : i32, i32, i32
  }
  func.func @transform_9(%arg0: i32) -> (i32, i32, i32) {
    %c0_i32 = arith.constant 0 : i32
    %c0_i32_0 = arith.constant 0 : i32
    %c0_i32_1 = arith.constant 0 : i32
    return %arg0, %c0_i32, %c0_i32_0 : i32, i32, i32
  }
  func.func @transform_10(%arg0: i32) -> (i32, i32, i32) {
    %c0_i32 = arith.constant 0 : i32
    %c0_i32_0 = arith.constant 0 : i32
    %c0_i32_1 = arith.constant 0 : i32
    return %arg0, %c0_i32, %c0_i32_0 : i32, i32, i32
  }
  func.func @transform_11(%arg0: i32) -> (i32, i32, i32) {
    %c0_i32 = arith.constant 0 : i32
    %c0_i32_0 = arith.constant 0 : i32
    %c0_i32_1 = arith.constant 0 : i32
    return %arg0, %c0_i32, %c0_i32_0 : i32, i32, i32
  }
  func.func @transform_12(%arg0: i32) -> (i32, i32, i32) {
    %c0_i32 = arith.constant 0 : i32
    %c0_i32_0 = arith.constant 0 : i32
    %c0_i32_1 = arith.constant 0 : i32
    return %arg0, %c0_i32, %c0_i32_0 : i32, i32, i32
  }
  func.func @transform_13(%arg0: i32) -> (i32, i32, i32) {
    %c0_i32 = arith.constant 0 : i32
    %c0_i32_0 = arith.constant 0 : i32
    %c0_i32_1 = arith.constant 0 : i32
    return %arg0, %c0_i32, %c0_i32_0 : i32, i32, i32
  }
  func.func @transform_14(%arg0: i32) -> (i32, i32, i32) {
    %c0_i32 = arith.constant 0 : i32
    %c0_i32_0 = arith.constant 0 : i32
    %c0_i32_1 = arith.constant 0 : i32
    return %arg0, %c0_i32, %c0_i32_0 : i32, i32, i32
  }
  func.func @transform_15(%arg0: i32) -> (i32, i32, i32) {
    %c0_i32 = arith.constant 0 : i32
    %c0_i32_0 = arith.constant 0 : i32
    %c0_i32_1 = arith.constant 0 : i32
    return %arg0, %c0_i32, %c0_i32_0 : i32, i32, i32
  }
  func.func @transform_16(%arg0: i32) -> (i32, i32) {
    %c0_i32 = arith.constant 0 : i32
    %c0_i32_0 = arith.constant 0 : i32
    %c0_i32_1 = arith.constant 0 : i32
    return %c0_i32, %c0_i32_0 : i32, i32
  }
  func.func @transform_17(%arg0: i32) -> (i32, i32) {
    %c0_i32 = arith.constant 0 : i32
    %c0_i32_0 = arith.constant 0 : i32
    %c0_i32_1 = arith.constant 0 : i32
    return %c0_i32, %c0_i32_0 : i32, i32
  }
  func.func @transform_18(%arg0: i32) -> (i32, i32) {
    %c0_i32 = arith.constant 0 : i32
    %c0_i32_0 = arith.constant 0 : i32
    %c0_i32_1 = arith.constant 0 : i32
    return %c0_i32, %c0_i32_0 : i32, i32
  }
  func.func @transform_19(%arg0: i32) -> (i32, i32) {
    %c0_i32 = arith.constant 0 : i32
    %c0_i32_0 = arith.constant 0 : i32
    %c0_i32_1 = arith.constant 0 : i32
    return %c0_i32, %c0_i32_0 : i32, i32
  }
  func.func @transform_20(%arg0: i32) -> (i32, i32) {
    %c0_i32 = arith.constant 0 : i32
    %c0_i32_0 = arith.constant 0 : i32
    %c0_i32_1 = arith.constant 0 : i32
    return %c0_i32, %c0_i32_0 : i32, i32
  }
}

</mosaic_0001>

<bundles_post_ra>
// kernel: distilbert_classifier_forward.1
= control target key start
LH: loop header
LB: loop body
LE: loop exit
PB: predicated region body
PF: predicated region fallthrough
CT: control target
= control target key end

     0   :  { %s4661_s0 = inlined_call_operand.vmem [shape: f32[16,128], index: 0, kind: input, shape index: {}]   ;;  %s4662_s1 = inlined_call_operand.vmem [shape: f32[4,1,8], index: 1, kind: input, shape index: {}]   ;;  %s4663_s2 = inlined_call_operand.vmem [shape: f32[1,128], index: 2, kind: input, shape index: {}]   ;;  %s4664_s3 = inlined_call_operand.vmem [shape: f32[1,128], index: 3, kind: input, shape index: {}]   ;;  %s4665_s4 = inlined_call_operand.hbm [shape: bf16[2,128,384], index: 4, kind: input, shape index: {}]   ;;  %s4666_s5 = inlined_call_operand.vmem [shape: f32[2,1,384], index: 5, kind: input, shape index: {}]   ;;  %s4667_s6 = inlined_call_operand.vmem [shape: bf16[2,128,128], index: 6, kind: input, shape index: {}]   ;;  %s4668_s7 = inlined_call_operand.vmem [shape: f32[2,1,128], index: 7, kind: input, shape index: {}]   ;;  %s4669_s8 = inlined_call_operand.vmem [shape: f32[2,1,128], index: 8, kind: input, shape index: {}]   ;;  %s4670_s9 = inlined_call_operand.vmem [shape: f32[2,1,128], index: 9, kind: input, shape index: {}]   ;;  %s4671_s10 = inlined_call_operand.hbm [shape: bf16[2,128,512], index: 10, kind: input, shape index: {}]   ;;  %s4672_s11 = inlined_call_operand.vmem [shape: f32[2,1,512], index: 11, kind: input, shape index: {}]   ;;  %s4673_s12 = inlined_call_operand.hbm [shape: bf16[2,512,128], index: 12, kind: input, shape index: {}]   ;;  %s4674_s13 = inlined_call_operand.vmem [shape: f32[2,1,128], index: 13, kind: input, shape index: {}]   ;;  %s4675_s14 = inlined_call_operand.vmem [shape: f32[2,1,128], index: 14, kind: input, shape index: {}]   ;;  %s4676_s15 = inlined_call_operand.vmem [shape: f32[2,1,128], index: 15, kind: input, shape index: {}]   ;;  %s4677_s16 = inlined_call_operand.vmem [shape: bf16[128,128], index: 16, kind: input, shape index: {}]   ;;  %s4678_s17 = inlined_call_operand.vmem [shape: f32[1,128], index: 17, kind: input, shape index: {}]   ;;  %s4679_s18 = inlined_call_operand.hbm [shape: bf16[128,128], index: 18, kind: input, shape index: {}]   ;;  %s4680_s19 = inlined_call_operand.vmem [shape: f32[1,128], index: 19, kind: input, shape index: {}]   ;;  %s4681_s20 = inlined_call_operand.hbm [shape: f32[2,128], index: 20, kind: output, shape index: {}]  }
   0x1   :  { %4694 = sst [smem:[#allocation19_spill]] %s4661_s0 }
   0x2   :  { %4695 = sst [smem:[#allocation20_spill]] %s4662_s1 }
   0x3   :  { %4696 = sst [smem:[#allocation21_spill]] %s4663_s2 }
   0x4   :  { %4697 = sst [smem:[#allocation22_spill]] %s4664_s3 }
   0x5   :  { %4698 = sst [smem:[#allocation23_spill]] %s4665_s4 }
   0x6   :  { %4699 = sst [smem:[#allocation24_spill]] %s4666_s5 }
   0x7   :  { %4700 = sst [smem:[#allocation25_spill]] %s4667_s6 }
   0x8   :  { %4701 = sst [smem:[#allocation26_spill]] %s4669_s8 }
   0x9   :  { %4702 = sst [smem:[#allocation27_spill]] %s4670_s9 }
   0xa   :  { %4703 = sst [smem:[#allocation28_spill]] %s4671_s10 }
   0xb   :  { %4704 = sst [smem:[#allocation29_spill]] %s4672_s11 }
   0xc   :  { %4705 = sst [smem:[#allocation30_spill]] %s4673_s12 }
   0xd   :  { %4706 = sst [smem:[#allocation31_spill]] %s4674_s13 }
   0xe   :  { %4707 = sst [smem:[#allocation32_spill]] %s4675_s14 }
   0xf   :  { %4708 = sst [smem:[#allocation33_spill]] %s4676_s15 }
  0x10   :  { %4709 = sst [smem:[#allocation34_spill]] %s4677_s16 }
  0x11   :  { %4710 = sst [smem:[#allocation35_spill]] %s4678_s17 }
  0x12   :  { %4711 = sst [smem:[#allocation36_spill]] %s4679_s18 }
  0x13   :  { %4712 = sst [smem:[#allocation37_spill]] %s4680_s19 }
  0x14   :  { %4713 = sst [smem:[#allocation38_spill]] %s4681_s20 }
  0x15   :  { %25 = vsyncpa [#allocation4], 0 }
  0x16   :  { %27 = vsyncpa [#allocation4 + $0x1], 0 }
  0x17   :  { %28 = vsyncpa [#allocation7], 0 }
  0x18   :  { %30 = vsyncpa [#allocation7 + $0x1], 0 }
  0x19   :  { %31 = vsyncpa [#allocation10], 0 }
  0x1a   :  { %32 = vsyncpa [#allocation5], 0  ;;  %s4005_s1 = smov 0   ;;  %s4007_s22 = smov 0  }
  0x1b   :  { %s4009_s23 = smov 0   ;;  %s4011_s24 = smov 0  }
  0x1c LB: > { %4714 = sst [smem:[#allocation16_spill]] %s3876_s23  ;;  %s4026_s2 = sadd.s32 1, %s3880_s24   ;;  %s3880_s24 = sphi %s4011_s24, %s4756_s24   ;;  %s3876_s23 = sphi %s4009_s23, %s4758_s23   ;;  %s3872_s22 = sphi %s4007_s22, %s4760_s22   ;;  %s3868_s1 = sphi %s4005_s1, %s4759_s1  }
  0x1d   : > { %4715 = sst [smem:[#allocation17_spill]] %s4026_s2  ;;  %s129_s25 = sadd.s32 1, %s3876_s23 }
  0x1e   : > { %s126_s3 = ssub.s32 %s3880_s24, %s4026_s2  ;;  %p136_p0 = scmp.ne.s32.totalorder %s3876_s23, %s3872_s22 }
  0x1f   : > { %p127_p1 = scmp.eq.s32.totalorder %s126_s3, 0  ;;  %p137_p2 = scmp.eq.s32.totalorder %s3880_s24, 0 }
  0x20   : > { %p3454_p3 = scmp.lt.s32.totalorder %s3880_s24, 2  ;;  %s4039_s27 = sand.u32 1, %s3876_s23  }
  0x21   : > { %s4036_s26 = scalar_select %p127_p1, %s3876_s23, %s129_s25  }
  0x22   : > { %p138_p4 = por %p137_p2, %p136_p0  ;;  %s645_s28 = sand.u32 1, %s3880_s24  }
  0x23   : > { %4716 = sst [smem:[#allocation18_spill]] %s4036_s26  ;;  %s4688_s4 = sshll.u32 %s4039_s27, 8 }
  0x24   : > { %p4043_p5 = pnand %p3454_p3, %p138_p4  ;;  %s4689_s30 = sshll.u32 %s3880_s24, 12 }
  0x25   : > { %s4718_s10 = sld [smem:[#allocation28_spill]]  ;;  %s649_s25 = scalar_lea.vmem [#allocation6], %s4688_s4 }
  0x26   : > { %s656_s26 = sshll.u32 %s649_s25, 4  ;;  %s4059_s23 = scalar_lea.sflag [#allocation7], %s645_s28  ;;  %s4057_s26 = int_to_ptr.vmem [resolvable:$true] %s656_s26 }
  0x27   : > { %p4065_p7 = pneg %p4043_p5 }
  0x2b   : > { %s4053_s3 = scalar_lea.hbm %s4718_s10, %s4689_s30  ;;  %s3705_s4 = scalar_lea.hbm %s4718_s10, 8192 }
  0x2c   : > { %s3700_s2 = scalar_lea.hbm %s4053_s3, 4096  ;;  %p3706_p10 = scmp.lt.s32.totalorder %s4053_s3, %s4718_s10 }
  0x2d   : > { %p3701_p6 = scmp.ne.s32.totalorder %s4053_s3, %s3700_s2  ;;  %p3707_p11 = scmp.lt.s32.totalorder %s3705_s4, %s3700_s2 }
  0x2f   : > { %p3703_p8 = pnand %p4065_p7, %p3701_p6  ;;  %p3708_p12 = por %p3707_p11, %p3706_p10 }
  0x31   : > { %p3704_p9 = pneg %p3703_p8 }
  0x33   : > { %p3709_p13 = pnand %p3708_p12, %p3704_p9 }
  0x35   : > { %3712 = shalt.err (!%p3709_p13)
}
  0x36   : > { %s3713_s28 = scalar_lea.vmem %s4057_s26, 4096  ;;  %s3882_s19 = smov [#allocation6]  }
  0x37   : > { %p3714_p0 = scmp.ne.s32.totalorder %s4057_s26, %s3713_s28  ;;  %s3718_s0 = sshll.u32 %s3882_s19, 4  ;;  %s3719_s0 = int_to_ptr.vmem [resolvable:$false] %s3718_s0 }
  0x38   : > { %s3720_s21 = scalar_lea.vmem %s3719_s0, 8192  ;;  %p3721_p3 = scmp.lt.s32.totalorder %s4057_s26, %s3719_s0 }
  0x39   : > { %p3716_p1 = pnand %p3714_p0, %p4065_p7  ;;  %p3722_p4 = scmp.lt.s32.totalorder %s3720_s21, %s3713_s28 }
  0x3b   : > { %p3717_p2 = pneg %p3716_p1  ;;  %p3723_p6 = por %p3722_p4, %p3721_p3 }
  0x3d   : > { %p3724_p8 = pnand %p3723_p6, %p3717_p2 }
  0x3f   : > { %3727 = shalt.err (!%p3724_p8)
}
  0x40   : > { %s3883_s2 = smov 256   ;;  %s3884_s19 = smov 16  }
  0x41   : > { %3449 = dma.hbm_to_vmem [thread:$0]  (!%p4043_p5), %s4053_s3, 4096, %s4057_s26, %s4059_s23, %s3883_s2, %s3883_s2, %s3884_s19  }
  0x42   : > { %s4720_s4 = sshll.u32 %s3880_s24, 12  ;;  %s4721_s12 = sld [smem:[#allocation30_spill]] }
  0x43   : > { %s4722_s0 = sshll.u32 %s4039_s27, 8  ;;  %s4100_s17 = sadd.s32 4294967295, %s3880_s24  }
  0x44   : > { %s677_s21 = scalar_lea.vmem [#allocation8], %s4722_s0  ;;  %p142_p9 = scmp.ne.s32.totalorder %s3872_s22, %s3868_s1 }
  0x45   : > { %s684_s10 = sshll.u32 %s677_s21, 4  ;;  %p4691_p10 = scmp.eq.s32.totalorder %s4100_s17, 0  ;;  %s4097_s10 = int_to_ptr.vmem [resolvable:$true] %s684_s10 }
  0x46   : > { %p3037_p11 = scmp.ge.s32.totalorder %s3880_s24, 1  ;;  %p544_p12 = scmp.lt.s32.totalorder %s3880_s24, 3 }
  0x47   : > { %p4110_p0 = por %p4691_p10, %p142_p9  ;;  %s3885_s2 = smov [#allocation9]  }
  0x48   : > { %s4093_s28 = scalar_lea.hbm %s4721_s12, %s4720_s4  ;;  %p4114_p1 = pnand %p3037_p11, %p544_p12 }
  0x49   : > { %s4723_s26 = scalar_select %p4110_p0, 1, 0 }
  0x4a   : > { %s4724_s3 = scalar_select %p4114_p1, 1, 0 }
  0x4b   : > { %s574_s19 = sshll.u32 %s3885_s2, 4  ;;  %p3439_p2 = pneg %p4114_p1  ;;  %s575_s19 = int_to_ptr.vmem [resolvable:$true] %s574_s19 }
  0x4c   : > { %s3421_s1 = smul.u32 192, %s4039_s27  ;;  %s4726_s21 = sld [smem:[#allocation23_spill]] }
  0x4d   : > { %p4123_p3 = pnand %p3439_p2, %p4691_p10  ;;  %s3422_s30 = smul.u32 3072, %s3880_s24 }
  0x4e   : > { %s3739_s15 = scalar_lea.vmem %s575_s19, 1024  ;;  %p3747_p11 = scmp.lt.s32.totalorder %s575_s19, %s575_s19 }
  0x4f   : > { %p3730_p4 = pneg %p4123_p3  ;;  %p3740_p6 = scmp.ne.s32.totalorder %s575_s19, %s3739_s15 }
  0x50   : > { %p3748_p12 = scmp.lt.s32.totalorder %s3739_s15, %s3739_s15 }
  0x51   : > { %p3742_p8 = pnand %p3740_p6, %p3730_p4 }
  0x52   : > { %s4131_s16 = scalar_lea.hbm %s4726_s21, %s3422_s30  ;;  %p3749_p13 = por %p3748_p12, %p3747_p11 }
  0x53   : > { %p3743_p9 = pneg %p3742_p8 }
  0x55   : > { %p3750_p2 = pnand %p3749_p13, %p3743_p9 }
  0x57   : > { %3753 = shalt.err (!%p3750_p2)
}
  0x58   : > { %s3886_s2 = smov 64   ;;  %s3887_s24 = smov 4  }
  0x59   : > { %s4727_s18 = sld [smem:[#allocation36_spill]]  ;;  %s595_s15 = scalar_lea.vmem [#allocation3], %s3421_s1 }
  0x5a   : > { %s602_s0 = sshll.u32 %s595_s15, 4  ;;  %s592_s14 = scalar_lea.sflag [#allocation4], %s4039_s27  ;;  %s4143_s0 = int_to_ptr.vmem [resolvable:$true] %s602_s0 }
  0x5b   : > { %s3754_s13 = scalar_lea.hbm %s4131_s16, 3072  ;;  %s3759_s4 = scalar_lea.hbm %s4726_s21, 6144 }
  0x5c   : > { %p3755_p13 = scmp.ne.s32.totalorder %s4131_s16, %s3754_s13  ;;  %p3760_p8 = scmp.lt.s32.totalorder %s4131_s16, %s4726_s21 }
  0x5d   : > { %p3761_p9 = scmp.lt.s32.totalorder %s3759_s4, %s3754_s13 }
  0x5e   : > { %p3757_p4 = pnand %p3755_p13, %p4065_p7 }
  0x5f   : > { %3442 = dma.hbm_to_vmem [thread:$0]  (!%p4123_p3), %s4727_s18, 1024, %s575_s19, [#allocation10], %s3886_s2, %s3886_s2, %s3887_s24  }
  0x60   : > { %p3758_p6 = pneg %p3757_p4  ;;  %p3762_p3 = por %p3761_p9, %p3760_p8 }
  0x62   : > { %p3763_p11 = pnand %p3762_p3, %p3758_p6 }
  0x64   : > { %3766 = shalt.err (!%p3763_p11)
}
  0x65   : > { %s3767_s19 = scalar_lea.vmem %s4143_s0, 3072  ;;  %s3888_s1 = smov [#allocation3]  }
  0x66   : > { %p3768_p12 = scmp.ne.s32.totalorder %s4143_s0, %s3767_s19  ;;  %s3772_s9 = sshll.u32 %s3888_s1, 4  ;;  %s3773_s9 = int_to_ptr.vmem [resolvable:$false] %s3772_s9 }
  0x67   : > { %s3774_s11 = scalar_lea.vmem %s3773_s9, 6144  ;;  %p3775_p4 = scmp.lt.s32.totalorder %s4143_s0, %s3773_s9 }
  0x68   : > { %p3770_p2 = pnand %p3768_p12, %p4065_p7  ;;  %p3776_p10 = scmp.lt.s32.totalorder %s3774_s11, %s3767_s19 }
  0x6a   : > { %p3771_p13 = pneg %p3770_p2  ;;  %p3777_p0 = por %p3776_p10, %p3775_p4 }
  0x6c   : > { %p3778_p1 = pnand %p3777_p0, %p3771_p13 }
  0x6e   : > { %3781 = shalt.err (!%p3778_p1)
}
  0x6f   : > { %s3889_s5 = smov 192   ;;  %s3890_s8 = smov 12  }
  0x70   : > { %3446 = dma.hbm_to_vmem [thread:$0]  (!%p4043_p5), %s4131_s16, 3072, %s4143_s0, %s592_s14, %s3889_s5, %s3889_s5, %s3890_s8  }
  0x71   : > { %s3782_s13 = scalar_lea.hbm %s4093_s28, 4096  ;;  %s3787_s15 = scalar_lea.hbm %s4721_s12, 8192 }
  0x72   : > { %p3783_p6 = scmp.ne.s32.totalorder %s4093_s28, %s3782_s13  ;;  %p3788_p0 = scmp.lt.s32.totalorder %s4093_s28, %s4721_s12 }
  0x73   : > { %p3789_p1 = scmp.lt.s32.totalorder %s3787_s15, %s3782_s13 }
  0x74   : > { %p3785_p8 = pnand %p3783_p6, %p4065_p7 }
  0x75   : > { %p3790_p9 = por %p3789_p1, %p3788_p0 }
  0x76   : > { %p3786_p10 = pneg %p3785_p8 }
  0x78   : > { %p3791_p3 = pnand %p3790_p9, %p3786_p10 }
  0x7a   : > { %3794 = shalt.err (!%p3791_p3)
}
  0x7b   : > { %s3795_s14 = scalar_lea.vmem %s4097_s10, 4096  ;;  %s3891_s16 = smov [#allocation8]  }
  0x7c   : > { %p3796_p11 = scmp.ne.s32.totalorder %s4097_s10, %s3795_s14  ;;  %s3800_s27 = sshll.u32 %s3891_s16, 4  ;;  %s3801_s27 = int_to_ptr.vmem [resolvable:$false] %s3800_s27 }
  0x7d   : > { %s3802_s0 = scalar_lea.vmem %s3801_s27, 8192  ;;  %p3803_p13 = scmp.lt.s32.totalorder %s4097_s10, %s3801_s27 }
  0x7e   : > { %p3798_p12 = pnand %p3796_p11, %p4065_p7  ;;  %p3804_p4 = scmp.lt.s32.totalorder %s3802_s0, %s3795_s14 }
  0x80   : > { %p3799_p2 = pneg %p3798_p12  ;;  %p3805_p6 = por %p3804_p4, %p3803_p13 }
  0x82   : > { %p3806_p8 = pnand %p3805_p6, %p3799_p2 }
  0x84   : > { %3809 = shalt.err (!%p3806_p8)
}
  0x85   : > { %3452 = dma.hbm_to_vmem [thread:$0]  (!%p4043_p5), %s4093_s28, 4096, %s4097_s10, %s4059_s23, %s3886_s2, %s3886_s2, %s3887_s24  }
  0x86   : > { %p4728_p7 = scmp.ne.s32.totalorder %s4724_s3, 0 }
  0x87   : > { %s716_s20 = sand.u32 (!%p4728_p7), 1, %s3872_s22   ;;  %p4729_p10 = scmp.ne.s32.totalorder (!%p4728_p7), %s4723_s26, 0 }
  0x88   : > { %714 = sbr.rel (%p4728_p7) target bundleno = 3373 (0xd2d), region = 100  ;;  %s717_s9 = scalar_lea.sflag (!%p4728_p7), [#allocation4], %s716_s20 }
  0x89   : > { %s3423_s1 = smul.u32 (!%p4728_p7), 192, %s716_s20 }
  0x8b   : > { %s4195_s11 = scalar_lea.vmem (!%p4728_p7), [#allocation3], %s3423_s1 }
  0x8d   : > { %3851 = dma.done.wait (%p4729_p10), %s717_s9, 3072  }
  0x8e   : > { %3853 = vsyncadd (%p4729_p10), %s717_s9, 4294964224  ;;  %s725_s29 = sand.u32 1, %s4100_s17   ;;  %s3048_s5 = sshll.u32 %s716_s20, 8 }
  0x8f   : > { %s726_s10 = scalar_lea.sflag [#allocation7], %s725_s29  ;;  %s4202_s23 = scalar_lea.vmem [#allocation6], %s3048_s5 }
  0x90   : > { %3855 = dma.done.wait (%p4729_p10), %s726_s10, 8192  }
  0x91   : > { %3857 = vsyncadd (%p4729_p10), %s726_s10, 4294959104  ;;  %s4208_s28 = scalar_lea.vmem [#allocation8], %s3048_s5  ;;  %p4730_p5 = scmp.eq.s32.totalorder %s4100_s17, 0 }
  0x93   : > { %3859 = dma.done.wait (%p4730_p5), [#allocation10], 1024   ;;  %p4731_p0 = pmov %p4730_p5 }
  0x94   : > { %p835_p1 = scmp.lt.s32.totalorder %s4100_s17, 1  ;;  %s4732_s6 = sld [smem:[#allocation25_spill]] }
  0x95   : > { %3861 = vsyncadd (%p4731_p0), [#allocation10], 4294966272  ;;  %s4733_s14 = sld [smem:[#allocation24_spill]]  ;;  %p4740_p9 = scmp.ne.s32.totalorder %s4100_s17, 0 }
  0x96   : > { %s4216_s3 = scalar_select %p835_p1, %s4100_s17, 1 }
  0x97   : > { %s4735_s5 = sld [smem:[#allocation27_spill]] }
  0x98   : > { %s3424_s26 = smul.u32 3, %s4216_s3  ;;  %s3196_s2 = sshll.u32 %s4216_s3, 6 }
  0x99   : > { %s3053_s24 = sshll.u32 %s4216_s3, 2  ;;  %s4737_s15 = sld [smem:[#allocation31_spill]] }
  0x9a   : > { %s4223_s13 = scalar_lea.vmem %s4732_s6, %s3196_s2  ;;  %s4736_s6 = sld [smem:[#allocation29_spill]] }
  0x9b   : > { %s4232_s16 = scalar_lea.vmem %s4733_s14, %s3424_s26  ;;  %s4738_s14 = sld [smem:[#allocation32_spill]] }
  0x9c   : > { %s4739_s20 = sld [smem:[#allocation33_spill]] }
  0x9d   : > { %s852_s10 = scalar_lea.vmem %s4735_s5, %s4216_s3  ;;  %s4741_s5 = sld [smem:[#allocation19_spill]] (!%p4740_p9) }
  0x9e   : > { %870 = sbr.rel (%p4740_p9) target bundleno = 475 (0x1db), region = 120  ;;  %s4742_s8 = sld [smem:[#allocation21_spill]] (!%p4740_p9) }
  0x9f   : > { %s859_s4 = scalar_lea.vmem %s4737_s15, %s4216_s3  ;;  %s4743_s26 = sld [smem:[#allocation22_spill]] (!%p4740_p9) }
  0xa0   : > { %s4246_s12 = scalar_lea.vmem %s4736_s6, %s3053_s24 }
  0xa1   : > { %s862_s18 = scalar_lea.vmem %s4738_s14, %s4216_s3 }
  0xa2   : > { %s865_s1 = scalar_lea.vmem %s4739_s20, %s4216_s3 }
  0xa3   : > { %v871_v0 = vld [vmem:[%s4741_s5] sm:$0xff]  ;;  %v872_v1 = vld [vmem:[%s4741_s5 + $0x8] sm:$0xff]  ;;  %v3892_v10 = vmov 0.0  }
  0xa4   : > { %875 = vadd.xlane.f32.xlu0 %v871_v0  ;;  %916 = vst [vmem:[#allocation11] sm:$0x3] %v3892_v10  ;;  %v3055_v18 = vld [vmem:[%s4742_s8] ss:$0 sm:$0xff] }
  0xa5   : > { %v3056_v20 = vld [vmem:[%s4743_s26] ss:$0 sm:$0xff] }
  0xa8   : > { %877 = vadd.xlane.f32.xlu0 %v872_v1 }
 0x12d   : > { %v876_v2 = vpop.xlane.xlu0 %875 }
 0x12e   : > { %v880_v3 = vmul.f32 0.0078125, %v876_v2 }
 0x130   : > { %v882_v4 = vsub.f32 %v871_v0, %v880_v3 }
 0x131   : > { %v878_v5 = vpop.xlane.xlu0 %877 }
 0x132   : > { %v881_v6 = vmul.f32 0.0078125, %v878_v5  ;;  %v884_v7 = vmul.f32 %v882_v4, %v882_v4 }
 0x134   : > { %v883_v8 = vsub.f32 %v872_v1, %v881_v6  ;;  %886 = vadd.xlane.f32.xlu1 %v884_v7 }
 0x136   : > { %v885_v9 = vmul.f32 %v883_v8, %v883_v8 }
 0x138   : > { %888 = vadd.xlane.f32.xlu1 %v885_v9 }
 0x1bd   : > { %v887_v11 = vpop.xlane.xlu1 %886 }
 0x1be   : > { %v890_v12 = vmul.f32 0.0078125, %v887_v11 }
 0x1c0   : > { %v892_v13 = vadd.f32 1e-12, %v890_v12 }
 0x1c1   : > { %v889_v14 = vpop.xlane.xlu1 %888 }
 0x1c2   : > { %3505 = vrsqrt.f32 %v892_v13  ;;  %v891_v15 = vmul.f32 0.0078125, %v889_v14 }
 0x1c4   : > { %v893_v16 = vadd.f32 1e-12, %v891_v15 }
 0x1c6   : > { %3507 = vrsqrt.f32 %v893_v16 }
 0x1cf   : > { %v3506_v17 = vpop.eup %3505 }
 0x1d0   : > { %v896_v19 = vmul.f32 %v3506_v17, %v882_v4 }
 0x1d2   : > { %v904_v21 = vmul.f32 %v3055_v18, %v896_v19 }
 0x1d3   : > { %v3508_v22 = vpop.eup %3507 }
 0x1d4   : > { %v912_v23 = vadd.f32 %v3056_v20, %v904_v21  ;;  %v897_v24 = vmul.f32 %v3508_v22, %v883_v8 }
 0x1d6   : > { %914 = vst [vmem:[#allocation2] sm:$0xff] %v912_v23  ;;  %v905_v25 = vmul.f32 %v3055_v18, %v897_v24 }
 0x1d8   : > { %v913_v26 = vadd.f32 %v3056_v20, %v905_v25 }
 0x1da   : > { %915 = vst [vmem:[#allocation2 + $0x8] sm:$0xff] %v913_v26 }
 0x1db PF: > { %v3524_v27 = vld [vmem:[%s4195_s11 + $0xac] ss:$12 sps:$4 sm:$0xff]   ;;  %v3526_v28 = vld [vmem:[%s4195_s11 + $0xa8] ss:$12 sps:$4 sm:$0xff]   ;;  %v3893_v29 = vmov 0   ;;  %v3894_v30 = vmov 0.0   ;;  %v958_v56 = vlaneseq  ;;  %s4745_s15 = scalar_lea.vmem %s4668_s7, %s4216_s3 }
 0x1dc   : > { %1133 = vmatprep.mubr.bf16.mxu0 %v3893_v29  ;;  %3293 = vmatprep.subr.bf16.mxu1 %v3894_v30  ;;  %v3527_v31 = vld [vmem:[%s4195_s11 + $0x94] ss:$12 sps:$4 sm:$0xff]   ;;  %v3529_v32 = vld [vmem:[%s4195_s11 + $0x90] ss:$12 sps:$4 sm:$0xff]   ;;  %v3532_v34 = vld [vmem:[%s4195_s11 + $0x78] ss:$12 sps:$4 sm:$0xff]  }
 0x1dd   : > { %1101 = vmatprep.subr.bf16.mxu0 %v3524_v27  ;;  %v3530_v33 = vld [vmem:[%s4195_s11 + $0x7c] ss:$12 sps:$4 sm:$0xff]   ;;  %v3533_v35 = vld [vmem:[%s4195_s11 + $0x64] ss:$12 sps:$4 sm:$0xff]   ;;  %v3535_v36 = vld [vmem:[%s4195_s11 + $0x60] ss:$12 sps:$4 sm:$0xff]  }
 0x1de   : > { %1102 = vmatpush1.bf16.msra.mxu0 %v3526_v28  ;;  %v3536_v37 = vld [vmem:[%s4195_s11 + $0x4c] ss:$12 sps:$4 sm:$0xff]   ;;  %v3548_v38 = vld [vmem:[%s4195_s11 + $0xb0] ss:$12 sps:$4 sm:$0xff]   ;;  %v3538_v40 = vld [vmem:[%s4195_s11 + $0x48] ss:$12 sps:$4 sm:$0xff]  }
 0x1df   : > { %1103 = vmatprep.subr.bf16.mxu0 %v3527_v31  ;;  %3294 = vmatpush3.bf16.msra.mxu1 %v3548_v38  ;;  %v3549_v39 = vld [vmem:[%s4195_s11 + $0x98] ss:$12 sps:$4 sm:$0xff]   ;;  %v3539_v41 = vld [vmem:[%s4195_s11 + $0x34] ss:$12 sps:$4 sm:$0xff]   ;;  %v3541_v42 = vld [vmem:[%s4195_s11 + $0x30] ss:$12 sps:$4 sm:$0xff]  }
 0x1e0   : > { %3295 = vmatprep.subr.bf16.mxu1 %v3894_v30  ;;  %v3550_v43 = vld [vmem:[%s4195_s11 + $0x80] ss:$12 sps:$4 sm:$0xff]   ;;  %v3542_v44 = vld [vmem:[%s4195_s11 + $0x1c] ss:$12 sps:$4 sm:$0xff]   ;;  %v3544_v46 = vld [vmem:[%s4195_s11 + $0x18] ss:$12 sps:$4 sm:$0xff]  }
 0x1e1   : > { %v3551_v45 = vld [vmem:[%s4195_s11 + $0x68] ss:$12 sps:$4 sm:$0xff]   ;;  %v3545_v47 = vld [vmem:[%s4195_s11 + $0x4] ss:$12 sps:$4 sm:$0xff]   ;;  %v3547_v49 = vld [vmem:[%s4195_s11] ss:$12 sps:$4 sm:$0xff]  }
 0x1e2   : > { %1104 = vmatpush1.bf16.msra.mxu0 %v3529_v32  ;;  %v3552_v48 = vld [vmem:[%s4195_s11 + $0x50] ss:$12 sps:$4 sm:$0xff]   ;;  %v3553_v52 = vld [vmem:[%s4195_s11 + $0x38] ss:$12 sps:$4 sm:$0xff]   ;;  %v3554_v54 = vld [vmem:[%s4195_s11 + $0x20] ss:$12 sps:$4 sm:$0xff]  }
 0x1e3   : > { %1105 = vmatprep.subr.bf16.mxu0 %v3530_v33  ;;  %3296 = vmatpush3.bf16.msra.mxu1 %v3549_v39  ;;  %v4300_v50 = vld [vmem:[#allocation2] sm:$0xff]  ;;  %v4302_v51 = vld [vmem:[#allocation2 + $0x8] sm:$0xff]  ;;  %vm3895_vm0 = vmmov 0   ;;  %v4321_v57 = vshrl.u32 %v958_v56, 7  ;;  %vm1245_vm1 = vcmask 523264   ;;  %vm1482_vm2 = vcmask 1043456  }
 0x1e4   : > { %3297 = vmatprep.subr.bf16.mxu1 %v3894_v30  ;;  %v919_v53 = vpack.c.bf16 %v4302_v51, %v4300_v50  ;;  %v3555_v55 = vld [vmem:[%s4195_s11 + $0x8] ss:$12 sps:$4 sm:$0xff]   ;;  %3309 = vmatprep.mubr.msk.bf16.mxu1 %vm3895_vm0, %v3894_v30  ;;  %v956_v59 = vld [vmem:[%s4232_s16] sm:$0x7]  ;;  %s3896_s11 = smov 64   ;;  %s4744_s14 = sld [smem:[#allocation20_spill]] }
 0x1e5   : > { %v964_v58 = vsub.s32 1, %v4321_v57  ;;  %v960_v60 = vsub.s32 0, %v4321_v57  ;;  %v968_v14 = vsub.s32 2, %v4321_v57  ;;  %vm1430_vm3 = vcmask 64512   ;;  %s4746_s8 = sld [smem:[#allocation26_spill]]  ;;  %p3171_p3 = scmp.ne.s32.totalorder %s4100_s17, 1 }
 0x1e6   : > { %1106 = vmatpush1.bf16.msra.mxu0 %v3532_v34  ;;  %s4754_s27 = sld [smem:[#allocation37_spill]] (!%p3171_p3) }
 0x1e7   : > { %1107 = vmatprep.subr.bf16.mxu0 %v3533_v35  ;;  %3298 = vmatpush3.bf16.msra.mxu1 %v3550_v43  ;;  %v965_v61 = vrot.slane %v956_v59, %v964_v58  ;;  %v961_v0 = vrot.slane %v956_v59, %v960_v60  ;;  %v969_v15 = vrot.slane %v956_v59, %v968_v14 }
 0x1e8   : > { %3299 = vmatprep.subr.bf16.mxu1 %v3894_v30 }
 0x1ea   : > { %1108 = vmatpush1.bf16.msra.mxu0 %v3535_v36  ;;  %v3083_v56 = vld [vmem:[%s4744_s14 + $0x2] ss:$0 sm:$0xff] }
 0x1eb   : > { %1109 = vmatprep.subr.bf16.mxu0 %v3536_v37  ;;  %3300 = vmatpush3.bf16.msra.mxu1 %v3551_v45  ;;  %s4747_s30 = scalar_lea.vmem %s4746_s8, %s4216_s3 }
 0x1ec   : > { %3301 = vmatprep.subr.bf16.mxu1 %v3894_v30 }
 0x1ee   : > { %1110 = vmatpush1.bf16.msra.mxu0 %v3538_v40  ;;  %v3081_v40 = vld [vmem:[%s4744_s14] ss:$0 sm:$0xff] }
 0x1ef   : > { %1111 = vmatprep.subr.bf16.mxu0 %v3539_v41  ;;  %3302 = vmatpush3.bf16.msra.mxu1 %v3552_v48 }
 0x1f0   : > { %3303 = vmatprep.subr.bf16.mxu1 %v3894_v30 }
 0x1f2   : > { %1112 = vmatpush1.bf16.msra.mxu0 %v3541_v42 }
 0x1f3   : > { %1113 = vmatprep.subr.bf16.mxu0 %v3542_v44  ;;  %3304 = vmatpush3.bf16.msra.mxu1 %v3553_v52 }
 0x1f4   : > { %3305 = vmatprep.subr.bf16.mxu1 %v3894_v30 }
 0x1f6   : > { %1114 = vmatpush1.bf16.msra.mxu0 %v3544_v46 }
 0x1f7   : > { %1115 = vmatprep.subr.bf16.mxu0 %v3545_v47  ;;  %3306 = vmatpush3.bf16.msra.mxu1 %v3554_v54  ;;  %v3082_v47 = vld [vmem:[%s4744_s14 + $0x1] ss:$0 sm:$0xff] }
 0x1f8   : > { %3307 = vmatprep.subr.bf16.mxu1 %v3894_v30 }
 0x1fa   : > { %1116 = vmatpush1.bf16.msra.mxu0 %v3547_v49 }
 0x1fb   : > { %3337 = vmatprep.subr.bf16.mxu0 %v3894_v30  ;;  %3308 = vmatpush3.bf16.msra.mxu1 %v3555_v55 }
 0x1fc   : > { %3313 = vmatprep.subr.bf16.mxu1 %v3894_v30 }
 0x1fd   : > { %1134 = vmatmul.mubr.bf16.vlgmr.msra.gmra.mxu0 %v919_v53 }
 0x1fe   : > { %3339 = vmatprep.mubr.msk.bf16.mxu0 %vm3895_vm0, %v3894_v30  ;;  %3310 = vmatmul.mubr.bf16.vlgmr.msra.gmra.mxu1 %v919_v53 }
 0x1ff   : > { %3315 = vmatprep.mubr.msk.bf16.mxu1 %vm3895_vm0, %v3894_v30 }
 0x2bd   : > { %v1135_v62 = vpop.f32.mrf.mxu0 }
 0x2be   : > { %v1136_v6 = vadd.f32 %v1135_v62, %v961_v0  ;;  %v1178_v16 = vpop.f32.mrf.mxu1 }
 0x2bf   : > { %v1137_v63 = vpop.f32.mrf.mxu0  ;;  %v4346_v18 = vadd.f32 %v1178_v16, %v969_v15 }
 0x2c0   : > { %v1138_v1 = vadd.f32 %v1137_v63, %v965_v61  ;;  %v1193_v11 = vpack.c.bf16 %v1136_v6, %v1136_v6  ;;  %v3311_v17 = vpop.f32.mrf.mxu1 }
 0x2c1   : > { %v1139_v2 = vpop.f32.mrf.mxu0  ;;  %v1217_v23 = vpack.c.bf16 %v4346_v18, %v4346_v18 }
 0x2c2   : > { %v1205_v3 = vpack.c.bf16 %v1138_v1, %v1138_v1  ;;  %v1140_v4 = vadd.f32 %v1139_v2, %v961_v0  ;;  %1199 = vrot.lane.b32.xlu0 %v1138_v1, %s3896_s11  ;;  %v1181_v19 = vpop.f32.mrf.mxu1  ;;  %v3084_v2 = vld [vmem:[%s4744_s14 + $0x3] ss:$0 sm:$0xff] }
 0x2c3   : > { %v1141_v5 = vpop.f32.mrf.mxu0  ;;  %v4348_v20 = vadd.f32 %v1181_v19, %v969_v15  ;;  %v1484_v24 = vsel %vm1482_vm2, %v1217_v23, 0 }
 0x2c4   : > { %v1142_v7 = vadd.f32 %v1141_v5, %v965_v61  ;;  %1189 = vrot.lane.b32.xlu1 %v1140_v4, %s3896_s11  ;;  %v1250_v8 = vsel %vm1245_vm1, %v1205_v3, 0  ;;  %v1194_v13 = vpack.c.bf16 %v1140_v4, %v1140_v4  ;;  %v3312_v21 = vpop.f32.mrf.mxu1  ;;  %3338 = vmatpush3.bf16.msra.mxu0 %v1484_v24 }
 0x2c5   : > { %3314 = vmatpush3.bf16.xpose.msra.mxu1 %v1250_v8  ;;  %v3514_v22 = vpack.i.bf16 %v4348_v20, %v4346_v18  ;;  %3349 = vmatprep.subr.bf16.mxu0 %v3894_v30  ;;  %v1218_v36 = vpack.c.bf16 %v4348_v20, %v4348_v20 }
 0x2c6   : > { %v3509_v9 = vpack.i.bf16 %v1142_v7, %v1136_v6  ;;  %3319 = vmatprep.subr.bf16.mxu1 %v3894_v30  ;;  %v1206_v10 = vpack.c.bf16 %v1142_v7, %v1142_v7 }
 0x2c7   : > { %v1530_v39 = vsel %vm1482_vm2, %v1218_v36, 0 }
 0x2c8   : > { %3510 = vrot.lane.b32.xlu0 %v3509_v9, %s3896_s11  ;;  %v1296_v12 = vsel %vm1245_vm1, %v1206_v10, 0 }
 0x2cc   : > { %3316 = vmatmul.mubr.msk.bf16.vlgmr.msra.gmra.mxu1 %vm1245_vm1, %v1193_v11 }
 0x2cd   : > { %3320 = vmatpush3.bf16.xpose.msra.mxu1 %v1296_v12  ;;  %3321 = vmatprep.mubr.msk.bf16.mxu1 %vm3895_vm0, %v3894_v30 }
 0x2ce   : > { %3325 = vmatprep.subr.bf16.mxu1 %v3894_v30 }
 0x2d4   : > { %3322 = vmatmul.mubr.msk.bf16.vlgmr.msra.gmra.mxu1 %vm1245_vm1, %v1194_v13 }
 0x2d5   : > { %3327 = vmatprep.mubr.msk.bf16.mxu1 %vm3895_vm0, %v3894_v30 }
 0x334   : > { %v1200_v25 = vpop.permute.xlu0 %1199 }
 0x335   : > { %v1207_v26 = vpack.c.bf16 %v1200_v25, %v1200_v25 }
 0x336   : > { %v1190_v37 = vpop.permute.xlu1 %1189 }
 0x337   : > { %v1342_v27 = vsel %vm1245_vm1, %v1207_v26, 0  ;;  %v1196_v38 = vpack.c.bf16 %v1190_v37, %v1190_v37 }
 0x338   : > { %3326 = vmatpush3.bf16.xpose.msra.mxu1 %v1342_v27 }
 0x339   : > { %3331 = vmatprep.subr.bf16.mxu1 %v3894_v30 }
 0x33a   : > { %v3511_v28 = vpop.permute.xlu0 %3510 }
 0x33b   : > { %v3513_v31 = vunpack.i.h.bf16 %v3511_v28  ;;  %v3512_v32 = vunpack.i.l.bf16 %v3511_v28 }
 0x33d   : > { %v1208_v33 = vpack.c.bf16 %v3513_v31, %v3513_v31  ;;  %v1195_v34 = vpack.c.bf16 %v3512_v32, %v3512_v32 }
 0x33f   : > { %3328 = vmatmul.mubr.msk.bf16.vlgmr.msra.gmra.mxu1 %vm1245_vm1, %v1195_v34  ;;  %v1388_v35 = vsel %vm1245_vm1, %v1208_v33, 0 }
 0x340   : > { %3332 = vmatpush3.bf16.xpose.msra.mxu1 %v1388_v35  ;;  %3333 = vmatprep.mubr.msk.bf16.mxu1 %vm3895_vm0, %v3894_v30 }
 0x341   : > { %3343 = vmatprep.subr.bf16.mxu1 %v3894_v30 }
 0x347   : > { %3334 = vmatmul.mubr.msk.bf16.vlgmr.msra.gmra.mxu1 %vm1245_vm1, %v1196_v38 }
 0x348   : > { %3344 = vmatpush3.bf16.msra.mxu1 %v1530_v39  ;;  %3345 = vmatprep.mubr.msk.bf16.mxu1 %vm3895_vm0, %v3894_v30 }
 0x349   : > { %3355 = vmatprep.subr.bf16.mxu1 %v3894_v30 }
 0x38c   : > { %v1286_v41 = vpop.f32.mrf.mxu1 }
 0x38d   : > { %v1287_v42 = vadd.f32 %v3081_v40, %v1286_v41 }
 0x38e   : > { %v3317_v43 = vpop.f32.mrf.mxu1 }
 0x38f   : > { %v1431_v44 = vsel %vm1430_vm3, %v1287_v42, -inf }
 0x390   : > { %1432 = vmax.xlane.f32.xlu1 %v1431_v44  ;;  %v1289_v45 = vpop.f32.mrf.mxu1 }
 0x392   : > { %v3318_v46 = vpop.f32.mrf.mxu1 }
 0x394   : > { %v1332_v48 = vpop.f32.mrf.mxu1 }
 0x395   : > { %v1333_v49 = vadd.f32 %v3082_v47, %v1332_v48 }
 0x396   : > { %v3323_v52 = vpop.f32.mrf.mxu1 }
 0x397   : > { %v1434_v53 = vsel %vm1430_vm3, %v1333_v49, -inf }
 0x398   : > { %1435 = vmax.xlane.f32.xlu0 %v1434_v53  ;;  %v1335_v54 = vpop.f32.mrf.mxu1 }
 0x39a   : > { %v3324_v55 = vpop.f32.mrf.mxu1 }
 0x3ff   : > { %v1378_v59 = vpop.f32.mrf.mxu1 }
 0x400   : > { %v1379_v61 = vadd.f32 %v3083_v56, %v1378_v59 }
 0x401   : > { %v3329_v62 = vpop.f32.mrf.mxu1 }
 0x402   : > { %v1437_v63 = vsel %vm1430_vm3, %v1379_v61, -inf }
 0x403   : > { %1438 = vmax.xlane.f32.xlu0 %v1437_v63  ;;  %v1381_v0 = vpop.f32.mrf.mxu1  ;;  %v3557_v63 = vld [vmem:[%s4223_s13 + $0x30] sm:$0xff]  }
 0x405   : > { %v3330_v1 = vpop.f32.mrf.mxu1 }
 0x407   : > { %v1424_v3 = vpop.f32.mrf.mxu1 }
 0x408   : > { %v1425_v4 = vadd.f32 %v3084_v2, %v1424_v3  ;;  %v3558_v2 = vld [vmem:[%s4223_s13 + $0x28] sm:$0xff]  }
 0x409   : > { %v3335_v5 = vpop.f32.mrf.mxu1 }
 0x40a   : > { %v1440_v6 = vsel %vm1430_vm3, %v1425_v4, -inf  ;;  %v3559_v5 = vld [vmem:[%s4223_s13 + $0x20] sm:$0xff]  }
 0x40b   : > { %1441 = vmax.xlane.f32.xlu1 %v1440_v6  ;;  %v1427_v7 = vpop.f32.mrf.mxu1 }
 0x40d   : > { %v3336_v8 = vpop.f32.mrf.mxu1 }
 0x40e   : > { %v3560_v8 = vld [vmem:[%s4223_s13 + $0x18] sm:$0xff]  }
 0x419   : > { %v1433_v9 = vpop.xlane.xlu1 %1432 }
 0x41a   : > { %v1443_v10 = vsub.f32 %v1287_v42, %v1433_v9  ;;  %v3561_v9 = vld [vmem:[%s4223_s13 + $0x10] sm:$0xff]  }
 0x41c   : > { %v1447_v11 = vmul.f32 1.442695, %v1443_v10  ;;  %v3562_v10 = vld [vmem:[%s4223_s13 + $0x8] sm:$0xff]  }
 0x41e   : > { %3644 = vpow2.f32 %v1447_v11  ;;  %v3563_v11 = vld [vmem:[%s4223_s13] sm:$0xff]  }
 0x421   : > { %v1436_v12 = vpop.xlane.xlu0 %1435 }
 0x422   : > { %v1444_v13 = vsub.f32 %v1333_v49, %v1436_v12 }
 0x424   : > { %v1449_v15 = vmul.f32 1.442695, %v1444_v13 }
 0x426   : > { %3646 = vpow2.f32 %v1449_v15 }
 0x42b   : > { %v3645_v16 = vpop.eup %3644 }
 0x42c   : > { %v1455_v17 = vsel %vm1430_vm3, %v3645_v16, 0.0 }
 0x42d   : > { %1456 = vadd.xlane.f32.xlu0 %v1455_v17 }
 0x433   : > { %v3647_v19 = vpop.eup %3646 }
 0x434   : > { %v1458_v21 = vsel %vm1430_vm3, %v3647_v19, 0.0 }
 0x435   : > { %1459 = vadd.xlane.f32.xlu1 %v1458_v21 }
 0x48c   : > { %v1439_v23 = vpop.xlane.xlu0 %1438 }
 0x48d   : > { %v1445_v24 = vsub.f32 %v1379_v61, %v1439_v23  ;;  %v3556_v61 = vld [vmem:[%s4223_s13 + $0x38] sm:$0xff]  }
 0x48f   : > { %v1451_v25 = vmul.f32 1.442695, %v1445_v24 }
 0x491   : > { %3648 = vpow2.f32 %v1451_v25 }
 0x494   : > { %v1442_v26 = vpop.xlane.xlu1 %1441 }
 0x495   : > { %v1446_v27 = vsub.f32 %v1425_v4, %v1442_v26 }
 0x497   : > { %v1453_v28 = vmul.f32 1.442695, %v1446_v27 }
 0x499   : > { %3650 = vpow2.f32 %v1453_v28 }
 0x49e   : > { %v3649_v31 = vpop.eup %3648 }
 0x49f   : > { %v1461_v32 = vsel %vm1430_vm3, %v3649_v31, 0.0 }
 0x4a0   : > { %1462 = vadd.xlane.f32.xlu0 %v1461_v32  ;;  %v3093_v32 = vld [vmem:[%s4745_s15] ss:$0 sm:$0xff] }
 0x4a6   : > { %v3651_v33 = vpop.eup %3650 }
 0x4a7   : > { %v1464_v34 = vsel %vm1430_vm3, %v3651_v33, 0.0 }
 0x4a8   : > { %1465 = vadd.xlane.f32.xlu1 %v1464_v34 }
 0x4b6   : > { %3515 = vrot.lane.b32.xlu0 %v3514_v22, %s3896_s11  ;;  %v1457_v35 = vpop.xlane.xlu0 %1456 }
 0x4b7   : > { %3652 = vrcp.f32 %v1457_v35 }
 0x4be   : > { %v1460_v36 = vpop.xlane.xlu1 %1459 }
 0x4bf   : > { %3654 = vrcp.f32 %v1460_v36 }
 0x4c4   : > { %v3653_v37 = vpop.eup %3652 }
 0x4c5   : > { %v1471_v38 = vmul.f32 %v3653_v37, %v3645_v16 }
 0x4c7   : > { %v1475_v39 = vpack.c.bf16 %v1471_v38, %v1471_v38 }
 0x4c9   : > { %3340 = vmatmul.mubr.msk.bf16.vlgmr.msra.gmra.mxu0 %vm1430_vm3, %v1475_v39 }
 0x4ca   : > { %3351 = vmatprep.mubr.msk.bf16.mxu0 %vm3895_vm0, %v3894_v30 }
 0x4cc   : > { %v3655_v40 = vpop.eup %3654 }
 0x4cd   : > { %v1472_v41 = vmul.f32 %v3655_v40, %v3647_v19 }
 0x4cf   : > { %v1476_v42 = vpack.c.bf16 %v1472_v41, %v1472_v41  ;;  %v3564_v41 = vld [vmem:[%s4202_s23 + $0xe0] ss:$16 sps:$4 sm:$0xff]  }
 0x4d1   : > { %3346 = vmatmul.mubr.msk.bf16.vlgmr.msra.gmra.mxu1 %vm1430_vm3, %v1476_v42  ;;  %v3566_v42 = vld [vmem:[%s4202_s23 + $0xe4] ss:$16 sps:$4 sm:$0xff]  }
 0x4d2   : > { %3357 = vmatprep.mubr.msk.bf16.mxu1 %vm3895_vm0, %v3894_v30 }
 0x529   : > { %v1463_v18 = vpop.xlane.xlu0 %1462 }
 0x52a   : > { %3656 = vrcp.f32 %v1463_v18  ;;  %v3569_v18 = vld [vmem:[%s4202_s23 + $0xec] ss:$16 sps:$4 sm:$0xff]  }
 0x52d   : > { %v3516_v20 = vpop.permute.xlu0 %3515 }
 0x52e   : > { %v3518_v22 = vunpack.i.h.bf16 %v3516_v20  ;;  %v3517_v43 = vunpack.i.l.bf16 %v3516_v20 }
 0x530   : > { %v1220_v44 = vpack.c.bf16 %v3518_v22, %v3518_v22  ;;  %v1219_v45 = vpack.c.bf16 %v3517_v43, %v3517_v43 }
 0x531   : > { %v1466_v46 = vpop.xlane.xlu1 %1465 }
 0x532   : > { %3658 = vrcp.f32 %v1466_v46  ;;  %v1576_v47 = vsel %vm1482_vm2, %v1219_v45, 0  ;;  %v1622_v48 = vsel %vm1482_vm2, %v1220_v44, 0 }
 0x533   : > { %3350 = vmatpush3.bf16.msra.mxu0 %v1576_v47  ;;  %3356 = vmatpush3.bf16.msra.mxu1 %v1622_v48  ;;  %v3572_v47 = vld [vmem:[%s4202_s23 + $0xc4] ss:$16 sps:$4 sm:$0xff]   ;;  %v3575_v48 = vld [vmem:[%s4202_s23 + $0xcc] ss:$16 sps:$4 sm:$0xff]  }
 0x534   : > { %3361 = vmatprep.subr.bf16.mxu0 %v3894_v30  ;;  %2045 = vmatprep.subr.bf16.mxu1 %v3566_v42  ;;  %v3616_v42 = vld [vmem:[%s4208_s28 + $0x70] sm:$0xff]  }
 0x537   : > { %v3657_v49 = vpop.eup %3656 }
 0x538   : > { %v1473_v52 = vmul.f32 %v3657_v49, %v3649_v31  ;;  %v3570_v49 = vld [vmem:[%s4202_s23 + $0xc0] ss:$16 sps:$4 sm:$0xff]  }
 0x53a   : > { %v1477_v53 = vpack.c.bf16 %v1473_v52, %v1473_v52  ;;  %v3573_v52 = vld [vmem:[%s4202_s23 + $0xc8] ss:$16 sps:$4 sm:$0xff]  }
 0x53c   : > { %3352 = vmatmul.mubr.msk.bf16.vlgmr.msra.gmra.mxu0 %vm1430_vm3, %v1477_v53  ;;  %v3578_v53 = vld [vmem:[%s4202_s23 + $0xa4] ss:$16 sps:$4 sm:$0xff]  }
 0x53d   : > { %3377 = vmatprep.mubr.msk.bf16.mxu0 %vm3895_vm0, %v3894_v30  ;;  %3362 = vmatpush3.bf16.msra.mxu0 %v3556_v61  ;;  %v3584_v61 = vld [vmem:[%s4202_s23 + $0x84] ss:$16 sps:$4 sm:$0xff]  }
 0x53e   : > { %3363 = vmatprep.subr.bf16.mxu0 %v3894_v30 }
 0x53f   : > { %v3659_v54 = vpop.eup %3658 }
 0x540   : > { %v1474_v55 = vmul.f32 %v3659_v54, %v3651_v33  ;;  %v3581_v54 = vld [vmem:[%s4202_s23 + $0xac] ss:$16 sps:$4 sm:$0xff]  }
 0x541   : > { %3364 = vmatpush3.bf16.msra.mxu0 %v3557_v63  ;;  %v3587_v63 = vld [vmem:[%s4202_s23 + $0x8c] ss:$16 sps:$4 sm:$0xff]  }
 0x542   : > { %v1478_v56 = vpack.c.bf16 %v1474_v55, %v1474_v55  ;;  %3365 = vmatprep.subr.bf16.mxu0 %v3894_v30  ;;  %v3576_v55 = vld [vmem:[%s4202_s23 + $0xa0] ss:$16 sps:$4 sm:$0xff]  }
 0x544   : > { %3358 = vmatmul.mubr.msk.bf16.vlgmr.msra.gmra.mxu1 %vm1430_vm3, %v1478_v56  ;;  %v3579_v56 = vld [vmem:[%s4202_s23 + $0xa8] ss:$16 sps:$4 sm:$0xff]  }
 0x545   : > { %2077 = vmatprep.mubr.bf16.mxu1 %v3893_v29  ;;  %3366 = vmatpush3.bf16.msra.mxu0 %v3558_v2  ;;  %v3588_v2 = vld [vmem:[%s4202_s23 + $0x60] ss:$16 sps:$4 sm:$0xff]  }
 0x546   : > { %3367 = vmatprep.subr.bf16.mxu0 %v3894_v30  ;;  %2046 = vmatpush1.bf16.msra.mxu1 %v3564_v41  ;;  %v3615_v41 = vld [vmem:[%s4208_s28 + $0xb8] sm:$0xff]  }
 0x547   : > { %2047 = vmatprep.subr.bf16.mxu1 %v3572_v47  ;;  %v3627_v47 = vld [vmem:[%s4208_s28 + $0xa0] sm:$0xff]  }
 0x549   : > { %3368 = vmatpush3.bf16.msra.mxu0 %v3559_v5  ;;  %v3599_v5 = vld [vmem:[%s4202_s23 + $0x4c] ss:$16 sps:$4 sm:$0xff]  }
 0x54a   : > { %3369 = vmatprep.subr.bf16.mxu0 %v3894_v30  ;;  %2048 = vmatpush1.bf16.msra.mxu1 %v3570_v49  ;;  %v3629_v49 = vld [vmem:[%s4208_s28 + $0xd8] sm:$0xff]  }
 0x54b   : > { %2049 = vmatprep.subr.bf16.mxu1 %v3578_v53  ;;  %v3631_v53 = vld [vmem:[%s4208_s28 + $0x98] sm:$0xff]  }
 0x54d   : > { %3370 = vmatpush3.bf16.msra.mxu0 %v3560_v8  ;;  %v3602_v8 = vld [vmem:[%s4202_s23 + $0x24] ss:$16 sps:$4 sm:$0xff]  }
 0x54e   : > { %3371 = vmatprep.subr.bf16.mxu0 %v3894_v30  ;;  %2050 = vmatpush1.bf16.msra.mxu1 %v3576_v55  ;;  %v3633_v55 = vld [vmem:[%s4208_s28 + $0xd0] sm:$0xff]  }
 0x54f   : > { %2051 = vmatprep.subr.bf16.mxu1 %v3584_v61  ;;  %v3636_v61 = vld [vmem:[%s4208_s28 + $0x48] sm:$0xff]  }
 0x551   : > { %3372 = vmatpush3.bf16.msra.mxu0 %v3561_v9  ;;  %v3605_v9 = vld [vmem:[%s4202_s23 + $0x2c] ss:$16 sps:$4 sm:$0xff]  }
 0x552   : > { %3373 = vmatprep.subr.bf16.mxu0 %v3894_v30 }
 0x555   : > { %3374 = vmatpush3.bf16.msra.mxu0 %v3562_v10  ;;  %v3600_v10 = vld [vmem:[%s4202_s23 + $0x20] ss:$16 sps:$4 sm:$0xff]  }
 0x556   : > { %3375 = vmatprep.subr.bf16.mxu0 %v3894_v30 }
 0x559   : > { %3376 = vmatpush3.bf16.msra.mxu0 %v3563_v11  ;;  %v3603_v11 = vld [vmem:[%s4202_s23 + $0x28] ss:$16 sps:$4 sm:$0xff]  }
 0x55a   : > { %2088 = vmatprep.subr.bf16.mxu0 %v3569_v18  ;;  %v3618_v18 = vld [vmem:[%s4208_s28 + $0x30] sm:$0xff]  }
 0x589   : > { %v1520_v59 = vpop.f32.mrf.mxu0 }
 0x58b   : > { %v3341_v62 = vpop.f32.mrf.mxu0 }
 0x58c   : > { %v3585_v62 = vld [vmem:[%s4202_s23 + $0x88] ss:$16 sps:$4 sm:$0xff]  }
 0x58d   : > { %v1523_v0 = vpop.f32.mrf.mxu0 }
 0x58e   : > { %v3590_v0 = vld [vmem:[%s4202_s23 + $0x64] ss:$16 sps:$4 sm:$0xff]  }
 0x58f   : > { %v3342_v1 = vpop.f32.mrf.mxu0 }
 0x590   : > { %v3593_v1 = vld [vmem:[%s4202_s23 + $0x6c] ss:$16 sps:$4 sm:$0xff]  }
 0x591   : > { %v1566_v3 = vpop.f32.mrf.mxu1 }
 0x593   : > { %v3347_v4 = vpop.f32.mrf.mxu1 }
 0x594   : > { %v3596_v4 = vld [vmem:[%s4202_s23 + $0x44] ss:$16 sps:$4 sm:$0xff]  }
 0x595   : > { %v1569_v6 = vpop.f32.mrf.mxu1 }
 0x596   : > { %v3594_v6 = vld [vmem:[%s4202_s23 + $0x40] ss:$16 sps:$4 sm:$0xff]  }
 0x597   : > { %v3348_v7 = vpop.f32.mrf.mxu1 }
 0x598   : > { %v3597_v7 = vld [vmem:[%s4202_s23 + $0x48] ss:$16 sps:$4 sm:$0xff]  }
 0x5fc   : > { %v1612_v12 = vpop.f32.mrf.mxu0 }
 0x5fe   : > { %v3353_v13 = vpop.f32.mrf.mxu0 }
 0x5ff   : > { %v3611_v13 = vld [vmem:[%s4202_s23 + $0xc] ss:$16 sps:$4 sm:$0xff]  }
 0x600   : > { %v1615_v15 = vpop.f32.mrf.mxu0 }
 0x601   : > { %v3606_v15 = vld [vmem:[%s4202_s23] ss:$16 sps:$4 sm:$0xff]  }
 0x602   : > { %v3354_v16 = vpop.f32.mrf.mxu0 }
 0x603   : > { %v3609_v16 = vld [vmem:[%s4202_s23 + $0x8] ss:$16 sps:$4 sm:$0xff]  }
 0x604   : > { %v1658_v17 = vpop.f32.mrf.mxu1 }
 0x605   : > { %v3519_v19 = vpack.i.bf16 %v1658_v17, %v1612_v12  ;;  %v3608_v12 = vld [vmem:[%s4202_s23 + $0x4] ss:$16 sps:$4 sm:$0xff]  }
 0x606   : > { %v3359_v21 = vpop.f32.mrf.mxu1 }
 0x607   : > { %3520 = vrot.lane.b32.xlu1 %v3519_v19, %s3896_s11 }
 0x608   : > { %v1661_v23 = vpop.f32.mrf.mxu1 }
 0x60a   : > { %v3360_v24 = vpop.f32.mrf.mxu1 }
 0x679   : > { %v3521_v25 = vpop.permute.xlu1 %3520 }
 0x67a   : > { %v3523_v26 = vunpack.i.h.bf16 %v3521_v25  ;;  %v3522_v27 = vunpack.i.l.bf16 %v3521_v25 }
 0x67c   : > { %v1673_v28 = vsel %vm1245_vm1, %v1566_v3, %v3523_v26  ;;  %v1672_v30 = vsel %vm1245_vm1, %v1520_v59, %v3522_v27  ;;  %v3582_v59 = vld [vmem:[%s4202_s23 + $0x80] ss:$16 sps:$4 sm:$0xff]   ;;  %v3591_v3 = vld [vmem:[%s4202_s23 + $0x68] ss:$16 sps:$4 sm:$0xff]  }
 0x67d   : > { %v1674_v31 = vpack.c.bf16 %v1673_v28, %v1672_v30  ;;  %2052 = vmatpush1.bf16.msra.mxu1 %v3582_v59  ;;  %v3102_v28 = vld [vmem:[%s4747_s30] ss:$0 sm:$0xff] }
 0x67e   : > { %2053 = vmatprep.subr.bf16.mxu1 %v3590_v0  ;;  %v3635_v59 = vld [vmem:[%s4208_s28 + $0x90] sm:$0xff]   ;;  %v3639_v0 = vld [vmem:[%s4208_s28 + $0x88] sm:$0xff]  }
 0x67f   : > { %3378 = vmatmul.mubr.bf16.vlgmr.msra.gmra.mxu0 %v1674_v31 }
 0x680   : > { %2120 = vmatprep.mubr.bf16.mxu0 %v3893_v29  ;;  %v3567_v29 = vld [vmem:[%s4202_s23 + $0xe8] ss:$16 sps:$4 sm:$0xff]  }
 0x681   : > { %2089 = vmatpush1.bf16.msra.mxu0 %v3567_v29  ;;  %2054 = vmatpush1.bf16.msra.mxu1 %v3588_v2  ;;  %v3617_v29 = vld [vmem:[%s4208_s28 + $0xf0] sm:$0xff]   ;;  %v3641_v2 = vld [vmem:[%s4208_s28 + $0xc0] sm:$0xff]  }
 0x682   : > { %2090 = vmatprep.subr.bf16.mxu0 %v3575_v48  ;;  %2055 = vmatprep.subr.bf16.mxu1 %v3596_v4  ;;  %v3628_v48 = vld [vmem:[%s4208_s28 + $0x58] sm:$0xff]   ;;  %v3643_v4 = vld [vmem:[%s4208_s28 + $0x80] sm:$0xff]  }
 0x685   : > { %2091 = vmatpush1.bf16.msra.mxu0 %v3573_v52  ;;  %2056 = vmatpush1.bf16.msra.mxu1 %v3594_v6  ;;  %v3630_v52 = vld [vmem:[%s4208_s28 + $0x18] sm:$0xff]   ;;  %v1879_v6 = vsub.s32 3, %v4321_v57 }
 0x686   : > { %2092 = vmatprep.subr.bf16.mxu0 %v3581_v54  ;;  %2057 = vmatprep.subr.bf16.mxu1 %v3602_v8  ;;  %v3632_v54 = vld [vmem:[%s4208_s28 + $0x50] sm:$0xff]  }
 0x689   : > { %2093 = vmatpush1.bf16.msra.mxu0 %v3579_v56  ;;  %2058 = vmatpush1.bf16.msra.mxu1 %v3600_v10  ;;  %v3634_v56 = vld [vmem:[%s4208_s28 + $0x10] sm:$0xff]  }
 0x68a   : > { %2094 = vmatprep.subr.bf16.mxu0 %v3587_v63  ;;  %2059 = vmatprep.subr.bf16.mxu1 %v3608_v12  ;;  %v3638_v63 = vld [vmem:[%s4208_s28 + $0x8] sm:$0xff]  }
 0x68d   : > { %2095 = vmatpush1.bf16.msra.mxu0 %v3585_v62  ;;  %2060 = vmatpush1.bf16.msra.mxu1 %v3606_v15  ;;  %v3637_v62 = vld [vmem:[%s4208_s28 + $0xc8] sm:$0xff]  }
 0x68e   : > { %2096 = vmatprep.subr.bf16.mxu0 %v3593_v1  ;;  %v3640_v1 = vld [vmem:[%s4208_s28 + $0x40] sm:$0xff]  }
 0x691   : > { %2097 = vmatpush1.bf16.msra.mxu0 %v3591_v3  ;;  %v3642_v3 = vld [vmem:[%s4208_s28] sm:$0xff]  }
 0x692   : > { %2098 = vmatprep.subr.bf16.mxu0 %v3599_v5  ;;  %v1863_v5 = vld [vmem:[%s4246_s12] sm:$0xf] }
 0x693   : > { %v1876_v8 = vrot.slane %v1863_v5, %v968_v14  ;;  %v1880_v10 = vrot.slane %v1863_v5, %v1879_v6 }
 0x695   : > { %2099 = vmatpush1.bf16.msra.mxu0 %v3597_v7  ;;  %v1868_v7 = vrot.slane %v1863_v5, %v960_v60 }
 0x696   : > { %2100 = vmatprep.subr.bf16.mxu0 %v3605_v9  ;;  %v1872_v9 = vrot.slane %v1863_v5, %v964_v58 }
 0x699   : > { %2101 = vmatpush1.bf16.msra.mxu0 %v3603_v11 }
 0x69a   : > { %2102 = vmatprep.subr.bf16.mxu0 %v3611_v13 }
 0x69d   : > { %2103 = vmatpush1.bf16.msra.mxu0 %v3609_v16 }
 0x73f   : > { %v1780_v33 = vpop.f32.mrf.mxu0 }
 0x740   : > { %v1781_v34 = vadd.f32 %v3093_v32, %v1780_v33  ;;  %v3103_v33 = vld [vmem:[%s852_s10] ss:$0 sm:$0xff] }
 0x741   : > { %v3379_v35 = vpop.f32.mrf.mxu0 }
 0x742   : > { %v1787_v36 = vadd.f32 %v1781_v34, %v4300_v50 }
 0x743   : > { %v1783_v37 = vpop.f32.mrf.mxu0 }
 0x744   : > { %v1784_v38 = vadd.f32 %v3093_v32, %v1783_v37  ;;  %1791 = vadd.xlane.f32.xlu1 %v1787_v36 }
 0x745   : > { %v3380_v39 = vpop.f32.mrf.mxu0 }
 0x746   : > { %v1788_v40 = vadd.f32 %v1784_v38, %v4302_v51  ;;  %v3612_v38 = vld [vmem:[%s4208_s28 + $0x78] sm:$0xff]  }
 0x747   : > { %v3613_v39 = vld [vmem:[%s4208_s28 + $0xf8] sm:$0xff]   ;;  %3231 = vmatprep.subr.bf16.mxu1 %v3612_v38 }
 0x748   : > { %1793 = vadd.xlane.f32.xlu0 %v1788_v40  ;;  %3253 = vmatprep.subr.bf16.mxu0 %v3613_v39 }
 0x7cd   : > { %v1792_v50 = vpop.xlane.xlu1 %1791 }
 0x7ce   : > { %v1796_v20 = vmul.f32 0.0078125, %v1792_v50  ;;  %v3619_v50 = vld [vmem:[%s4208_s28 + $0xb0] sm:$0xff]  }
 0x7d0   : > { %v4438_v22 = vsub.f32 %v1787_v36, %v1796_v20  ;;  %v3620_v20 = vld [vmem:[%s4208_s28 + $0x68] sm:$0xff]  }
 0x7d1   : > { %v1794_v43 = vpop.xlane.xlu0 %1793 }
 0x7d2   : > { %v1797_v51 = vmul.f32 0.0078125, %v1794_v43  ;;  %v1800_v44 = vmul.f32 %v4438_v22, %v4438_v22  ;;  %v3622_v43 = vld [vmem:[%s4208_s28 + $0x28] sm:$0xff]  }
 0x7d4   : > { %v4442_v45 = vsub.f32 %v1788_v40, %v1797_v51  ;;  %1802 = vadd.xlane.f32.xlu0 %v1800_v44  ;;  %v3614_v40 = vld [vmem:[%s4208_s28 + $0x38] sm:$0xff]   ;;  %v3623_v51 = vld [vmem:[%s4208_s28 + $0xa8] sm:$0xff]   ;;  %v3624_v44 = vld [vmem:[%s4208_s28 + $0x60] sm:$0xff]  }
 0x7d6   : > { %v1801_v46 = vmul.f32 %v4442_v45, %v4442_v45 }
 0x7d8   : > { %1804 = vadd.xlane.f32.xlu1 %v1801_v46  ;;  %v3626_v46 = vld [vmem:[%s4208_s28 + $0x20] sm:$0xff]  }
 0x85d   : > { %v1803_v17 = vpop.xlane.xlu0 %1802 }
 0x85e   : > { %v1806_v19 = vmul.f32 0.0078125, %v1803_v17 }
 0x860   : > { %v1808_v21 = vadd.f32 1e-12, %v1806_v19 }
 0x861   : > { %v1805_v23 = vpop.xlane.xlu1 %1804 }
 0x862   : > { %3660 = vrsqrt.f32 %v1808_v21  ;;  %v1807_v24 = vmul.f32 0.0078125, %v1805_v23 }
 0x864   : > { %v1809_v25 = vadd.f32 1e-12, %v1807_v24 }
 0x866   : > { %3662 = vrsqrt.f32 %v1809_v25 }
 0x86f   : > { %v3661_v26 = vpop.eup %3660 }
 0x870   : > { %v1812_v27 = vmul.f32 %v3661_v26, %v4438_v22  ;;  %v3621_v22 = vld [vmem:[%s4208_s28 + $0xe8] sm:$0xff]  }
 0x872   : > { %v1820_v32 = vmul.f32 %v3102_v28, %v1812_v27 }
 0x873   : > { %v3663_v30 = vpop.eup %3662 }
 0x874   : > { %v1813_v31 = vmul.f32 %v3663_v30, %v4442_v45  ;;  %v4486_v35 = vadd.f32 %v3103_v33, %v1820_v32  ;;  %v3625_v45 = vld [vmem:[%s4208_s28 + $0xe0] sm:$0xff]  }
 0x876   : > { %v1821_v34 = vmul.f32 %v3102_v28, %v1813_v31 }
 0x878   : > { %v4488_v36 = vadd.f32 %v3103_v33, %v1821_v34 }
 0x87a   : > { %v1830_v37 = vpack.c.bf16 %v4488_v36, %v4486_v35 }
 0x87c   : > { %2078 = vmatmul.mubr.bf16.vlgmr.msra.gmra.mxu1 %v1830_v37  ;;  %2121 = vmatmul.mubr.bf16.vlgmr.msra.gmra.mxu0 %v1830_v37 }
 0x87d   : > { %3232 = vmatpush3.bf16.msra.mxu1 %v3614_v40  ;;  %3254 = vmatpush3.bf16.msra.mxu0 %v3615_v41 }
 0x87e   : > { %3233 = vmatprep.subr.bf16.mxu1 %v3616_v42  ;;  %3255 = vmatprep.subr.bf16.mxu0 %v3617_v29 }
 0x881   : > { %3234 = vmatpush3.bf16.msra.mxu1 %v3618_v18  ;;  %3256 = vmatpush3.bf16.msra.mxu0 %v3619_v50 }
 0x882   : > { %3235 = vmatprep.subr.bf16.mxu1 %v3620_v20  ;;  %3257 = vmatprep.subr.bf16.mxu0 %v3621_v22 }
 0x885   : > { %3236 = vmatpush3.bf16.msra.mxu1 %v3622_v43  ;;  %3258 = vmatpush3.bf16.msra.mxu0 %v3623_v51 }
 0x886   : > { %3237 = vmatprep.subr.bf16.mxu1 %v3624_v44  ;;  %3259 = vmatprep.subr.bf16.mxu0 %v3625_v45 }
 0x889   : > { %3238 = vmatpush3.bf16.msra.mxu1 %v3626_v46  ;;  %3260 = vmatpush3.bf16.msra.mxu0 %v3627_v47 }
 0x88a   : > { %3239 = vmatprep.subr.bf16.mxu1 %v3628_v48  ;;  %3261 = vmatprep.subr.bf16.mxu0 %v3629_v49 }
 0x88d   : > { %3240 = vmatpush3.bf16.msra.mxu1 %v3630_v52  ;;  %3262 = vmatpush3.bf16.msra.mxu0 %v3631_v53 }
 0x88e   : > { %3241 = vmatprep.subr.bf16.mxu1 %v3632_v54  ;;  %3263 = vmatprep.subr.bf16.mxu0 %v3633_v55 }
 0x891   : > { %3242 = vmatpush3.bf16.msra.mxu1 %v3634_v56  ;;  %3264 = vmatpush3.bf16.msra.mxu0 %v3635_v59 }
 0x892   : > { %3243 = vmatprep.subr.bf16.mxu1 %v3636_v61  ;;  %3265 = vmatprep.subr.bf16.mxu0 %v3637_v62 }
 0x895   : > { %3244 = vmatpush3.bf16.msra.mxu1 %v3638_v63  ;;  %3266 = vmatpush3.bf16.msra.mxu0 %v3639_v0 }
 0x896   : > { %3245 = vmatprep.subr.bf16.mxu1 %v3640_v1  ;;  %3267 = vmatprep.subr.bf16.mxu0 %v3641_v2 }
 0x899   : > { %3246 = vmatpush3.bf16.msra.mxu1 %v3642_v3  ;;  %3268 = vmatpush3.bf16.msra.mxu0 %v3643_v4 }
 0x93c   : > { %v2079_v11 = vpop.f32.mrf.mxu1  ;;  %v2122_v12 = vpop.f32.mrf.mxu0 }
 0x93d   : > { %v4532_v13 = vadd.f32 %v2079_v11, %v1868_v7  ;;  %v4534_v15 = vadd.f32 %v2122_v12, %v1876_v8 }
 0x93e   : > { %v2081_v16 = vpop.f32.mrf.mxu1  ;;  %v2124_v17 = vpop.f32.mrf.mxu0 }
 0x93f   : > { %v2131_v19 = vmul.f32 %v4532_v13, %v4532_v13  ;;  %v2133_v60 = vmul.f32 %v4534_v15, %v4534_v15  ;;  %v4540_v21 = vadd.f32 %v2081_v16, %v1872_v9  ;;  %v4542_v14 = vadd.f32 %v2124_v17, %v1880_v10 }
 0x940   : > { %v2083_v57 = vpop.f32.mrf.mxu1  ;;  %v2126_v58 = vpop.f32.mrf.mxu0 }
 0x941   : > { %v2139_v23 = vmul.f32 %v2131_v19, %v4532_v13  ;;  %v2141_v24 = vmul.f32 %v2133_v60, %v4534_v15  ;;  %v2132_v25 = vmul.f32 %v4540_v21, %v4540_v21  ;;  %v2134_v26 = vmul.f32 %v4542_v14, %v4542_v14 }
 0x942   : > { %v4550_v27 = vadd.f32 %v2083_v57, %v1868_v7  ;;  %v4552_v28 = vadd.f32 %v2126_v58, %v1876_v8  ;;  %v2085_v30 = vpop.f32.mrf.mxu1  ;;  %v2128_v31 = vpop.f32.mrf.mxu0 }
 0x943   : > { %v2147_v32 = vmul.f32 0.044715, %v2139_v23  ;;  %v2149_v33 = vmul.f32 0.044715, %v2141_v24  ;;  %v2140_v34 = vmul.f32 %v2132_v25, %v4540_v21  ;;  %v2142_v37 = vmul.f32 %v2134_v26, %v4542_v14 }
 0x944   : > { %v2135_v38 = vmul.f32 %v4550_v27, %v4550_v27  ;;  %v2137_v39 = vmul.f32 %v4552_v28, %v4552_v28  ;;  %v4560_v40 = vadd.f32 %v2085_v30, %v1872_v9  ;;  %v4562_v41 = vadd.f32 %v2128_v31, %v1880_v10 }
 0x945   : > { %v2155_v42 = vadd.f32 %v2147_v32, %v4532_v13  ;;  %v2157_v29 = vadd.f32 %v2149_v33, %v4534_v15  ;;  %v2148_v18 = vmul.f32 0.044715, %v2140_v34  ;;  %v2150_v50 = vmul.f32 0.044715, %v2142_v37 }
 0x946   : > { %v2143_v20 = vmul.f32 %v2135_v38, %v4550_v27  ;;  %v2145_v22 = vmul.f32 %v2137_v39, %v4552_v28  ;;  %v2136_v43 = vmul.f32 %v4560_v40, %v4560_v40  ;;  %v2138_v51 = vmul.f32 %v4562_v41, %v4562_v41 }
 0x947   : > { %v2163_v44 = vmul.f32 0.7978846, %v2155_v42  ;;  %v2165_v45 = vmul.f32 0.7978846, %v2157_v29  ;;  %v2156_v46 = vadd.f32 %v2148_v18, %v4540_v21  ;;  %v2158_v47 = vadd.f32 %v2150_v50, %v4542_v14 }
 0x948   : > { %v2151_v48 = vmul.f32 0.044715, %v2143_v20  ;;  %v2153_v49 = vmul.f32 0.044715, %v2145_v22  ;;  %v2144_v52 = vmul.f32 %v2136_v43, %v4560_v40  ;;  %v2146_v53 = vmul.f32 %v2138_v51, %v4562_v41 }
 0x949   : > { %3664 = vtanh.f32 %v2163_v44  ;;  %v2164_v54 = vmul.f32 0.7978846, %v2156_v46  ;;  %v2166_v55 = vmul.f32 0.7978846, %v2158_v47 }
 0x94a   : > { %3666 = vtanh.f32 %v2165_v45  ;;  %v2159_v56 = vadd.f32 %v2151_v48, %v4550_v27  ;;  %v2161_v59 = vadd.f32 %v2153_v49, %v4552_v28  ;;  %v2152_v61 = vmul.f32 0.044715, %v2144_v52 }
 0x94b   : > { %3668 = vtanh.f32 %v2164_v54  ;;  %v2154_v62 = vmul.f32 0.044715, %v2146_v53 }
 0x94c   : > { %3670 = vtanh.f32 %v2166_v55  ;;  %v2167_v63 = vmul.f32 0.7978846, %v2159_v56  ;;  %v2169_v0 = vmul.f32 0.7978846, %v2161_v59  ;;  %v2160_v1 = vadd.f32 %v2152_v61, %v4560_v40 }
 0x94d   : > { %v2162_v2 = vadd.f32 %v2154_v62, %v4562_v41 }
 0x94e   : > { %3672 = vtanh.f32 %v2167_v63  ;;  %v2168_v3 = vmul.f32 0.7978846, %v2160_v1 }
 0x94f   : > { %3674 = vtanh.f32 %v2169_v0  ;;  %v2170_v4 = vmul.f32 0.7978846, %v2162_v2 }
 0x950   : > { %3676 = vtanh.f32 %v2168_v3 }
 0x951   : > { %3678 = vtanh.f32 %v2170_v4 }
 0x956   : > { %v3665_v5 = vpop.eup %3664 }
 0x957   : > { %v3667_v6 = vpop.eup %3666  ;;  %v2179_v11 = vadd.f32 1.0, %v3665_v5 }
 0x958   : > { %v3669_v7 = vpop.eup %3668  ;;  %v2181_v17 = vadd.f32 1.0, %v3667_v6 }
 0x959   : > { %v3671_v8 = vpop.eup %3670  ;;  %v2180_v9 = vadd.f32 1.0, %v3669_v7  ;;  %v2187_v26 = vmul.f32 0.5, %v2179_v11  ;;  %v3169_v11 = vld [vmem:[%s862_s18] ss:$0 sm:$0xff]  ;;  %s4752_s18 = sld [smem:[#allocation34_spill]] (!%p3171_p3) }
 0x95a   : > { %v2182_v12 = vadd.f32 1.0, %v3671_v8  ;;  %v2189_v33 = vmul.f32 0.5, %v2181_v17 }
 0x95b   : > { %v3673_v10 = vpop.eup %3672  ;;  %v2188_v25 = vmul.f32 0.5, %v2180_v9  ;;  %v2195_v18 = vmul.f32 %v2187_v26, %v4532_v13  ;;  %v3136_v13 = vld [vmem:[%s859_s4] ss:$0 sm:$0xff]  ;;  %s4753_s4 = sld [smem:[#allocation35_spill]] (!%p3171_p3) }
 0x95c   : > { %v3675_v16 = vpop.eup %3674  ;;  %v2183_v19 = vadd.f32 1.0, %v3673_v10  ;;  %v2190_v32 = vmul.f32 0.5, %v2182_v12  ;;  %v2197_v22 = vmul.f32 %v2189_v33, %v4534_v15 }
 0x95d   : > { %v3677_v60 = vpop.eup %3676  ;;  %v2185_v57 = vadd.f32 1.0, %v3675_v16  ;;  %v2196_v42 = vmul.f32 %v2188_v25, %v4540_v21  ;;  %v3170_v16 = vld [vmem:[%s865_s1] ss:$0 sm:$0xff] }
 0x95e   : > { %v3679_v58 = vpop.eup %3678  ;;  %v2191_v23 = vmul.f32 0.5, %v2183_v19  ;;  %v2184_v24 = vadd.f32 1.0, %v3677_v60  ;;  %v2198_v50 = vmul.f32 %v2190_v32, %v4542_v14 }
 0x95f   : > { %v2193_v30 = vmul.f32 0.5, %v2185_v57  ;;  %v2186_v31 = vadd.f32 1.0, %v3679_v58 }
 0x960   : > { %v2192_v34 = vmul.f32 0.5, %v2184_v24  ;;  %v2199_v37 = vmul.f32 %v2191_v23, %v4550_v27 }
 0x961   : > { %v2194_v38 = vmul.f32 0.5, %v2186_v31  ;;  %v2201_v39 = vmul.f32 %v2193_v30, %v4552_v28 }
 0x962   : > { %v2200_v29 = vmul.f32 %v2192_v34, %v4560_v40  ;;  %v2203_v44 = vpack.c.bf16 %v2199_v37, %v2195_v18 }
 0x963   : > { %v2202_v20 = vmul.f32 %v2194_v38, %v4562_v41  ;;  %v2205_v27 = vpack.c.bf16 %v2201_v39, %v2197_v22 }
 0x964   : > { %v2204_v43 = vpack.c.bf16 %v2200_v29, %v2196_v42 }
 0x965   : > { %v2206_v51 = vpack.c.bf16 %v2202_v20, %v2198_v50 }
 0x966   : > { %2502 = vmatprep.mubr.bf16.mxu1 %v2204_v43 }
 0x967   : > { %2543 = vmatprep.mubr.bf16.mxu0 %v2206_v51  ;;  %2503 = vmatmul.mubr.bf16.vlgmr.msra.gmra.mxu1 %v2203_v44 }
 0x968   : > { %2544 = vmatmul.mubr.bf16.vlgmr.msra.gmra.mxu0 %v2205_v27 }
 0xa27   : > { %v3247_v21 = vpop.f32.mrf.mxu1 }
 0xa28   : > { %v3269_v28 = vpop.f32.mrf.mxu0 }
 0xa29   : > { %v3248_v14 = vpop.f32.mrf.mxu1 }
 0xa2a   : > { %v3249_v40 = vadd.f32 %v3248_v14, %v3247_v21  ;;  %v3270_v41 = vpop.f32.mrf.mxu0 }
 0xa2b   : > { %v3250_v45 = vpop.f32.mrf.mxu1  ;;  %v3271_v46 = vadd.f32 %v3270_v41, %v3269_v28 }
 0xa2c   : > { %v2505_v15 = vadd.f32 %v3249_v40, %v3136_v13  ;;  %v3272_v47 = vpop.f32.mrf.mxu0 }
 0xa2d   : > { %v3251_v48 = vpop.f32.mrf.mxu1 }
 0xa2e   : > { %v2546_v49 = vadd.f32 %v3271_v46, %v2505_v15  ;;  %v3252_v52 = vadd.f32 %v3251_v48, %v3250_v45  ;;  %v3273_v53 = vpop.f32.mrf.mxu0 }
 0xa2f   : > { %v3274_v55 = vadd.f32 %v3273_v53, %v3272_v47 }
 0xa30   : > { %v2508_v54 = vadd.f32 %v3252_v52, %v3136_v13  ;;  %v2552_v56 = vadd.f32 %v2546_v49, %v4486_v35 }
 0xa32   : > { %v2549_v59 = vadd.f32 %v3274_v55, %v2508_v54  ;;  %2556 = vadd.xlane.f32.xlu0 %v2552_v56 }
 0xa34   : > { %v2553_v61 = vadd.f32 %v2549_v59, %v4488_v36 }
 0xa36   : > { %2558 = vadd.xlane.f32.xlu1 %v2553_v61 }
 0xabb   : > { %v2557_v62 = vpop.xlane.xlu0 %2556 }
 0xabc   : > { %v2560_v63 = vmul.f32 0.0078125, %v2557_v62 }
 0xabe   : > { %v2562_v0 = vsub.f32 %v2552_v56, %v2560_v63 }
 0xabf   : > { %v2559_v1 = vpop.xlane.xlu1 %2558 }
 0xac0   : > { %v2561_v2 = vmul.f32 0.0078125, %v2559_v1  ;;  %v2564_v3 = vmul.f32 %v2562_v0, %v2562_v0 }
 0xac2   : > { %v2563_v4 = vsub.f32 %v2553_v61, %v2561_v2  ;;  %2566 = vadd.xlane.f32.xlu0 %v2564_v3 }
 0xac4   : > { %v2565_v5 = vmul.f32 %v2563_v4, %v2563_v4 }
 0xac6   : > { %2568 = vadd.xlane.f32.xlu1 %v2565_v5 }
 0xb4b   : > { %v2567_v6 = vpop.xlane.xlu0 %2566 }
 0xb4c   : > { %v2570_v7 = vmul.f32 0.0078125, %v2567_v6 }
 0xb4e   : > { %v2572_v35 = vadd.f32 1e-12, %v2570_v7 }
 0xb4f   : > { %v2569_v8 = vpop.xlane.xlu1 %2568 }
 0xb50   : > { %3680 = vrsqrt.f32 %v2572_v35  ;;  %v2571_v9 = vmul.f32 0.0078125, %v2569_v8 }
 0xb52   : > { %v2573_v36 = vadd.f32 1e-12, %v2571_v9 }
 0xb54   : > { %3682 = vrsqrt.f32 %v2573_v36 }
 0xb5d   : > { %v3681_v10 = vpop.eup %3680 }
 0xb5e   : > { %v2576_v12 = vmul.f32 %v3681_v10, %v2562_v0 }
 0xb60   : > { %v2584_v17 = vmul.f32 %v3169_v11, %v2576_v12 }
 0xb61   : > { %v3683_v19 = vpop.eup %3682 }
 0xb62   : > { %v2592_v60 = vadd.f32 %v3170_v16, %v2584_v17  ;;  %v2577_v57 = vmul.f32 %v3683_v19, %v2563_v4 }
 0xb64   : > { %2594 = vst [vmem:[#allocation2] sm:$0xff] %v2592_v60  ;;  %v2585_v58 = vmul.f32 %v3169_v11, %v2577_v57  ;;  %2599 = sbr.rel (%p3171_p3) target bundleno = 3352 (0xd18), region = 124 }
 0xb66   : > { %v2593_v23 = vadd.f32 %v3170_v16, %v2585_v58 }
 0xb68   : > { %2595 = vst [vmem:[#allocation2 + $0x8] sm:$0xff] %v2593_v23 }
 0xb69   : > { %v3684_v24 = vld [vmem:[%s4752_s18 + $0x38] sm:$0xff]   ;;  %v3897_v25 = vmov 0.0   ;;  %v3685_v26 = vld [vmem:[%s4752_s18 + $0x30] sm:$0xff]   ;;  %vm3898_vm4 = vmmov 0   ;;  %v3686_v30 = vld [vmem:[%s4752_s18 + $0x28] sm:$0xff]   ;;  %v2601_v37 = vpack.c.bf16 %v2593_v23, %v2593_v23  ;;  %v2600_v42 = vpack.c.bf16 %v2592_v60, %v2592_v60 }
 0xb6a   : > { %3381 = vmatprep.subr.bf16.mxu0 %v3897_v25  ;;  %3401 = vmatprep.subr.bf16.mxu1 %v3897_v25  ;;  %v3692_v31 = vld [vmem:[#allocation9 + $0x38] sm:$0xff]   ;;  %v3687_v32 = vld [vmem:[%s4752_s18 + $0x20] sm:$0xff]   ;;  %v3688_v34 = vld [vmem:[%s4752_s18 + $0x18] sm:$0xff]   ;;  %vm2630_vm5 = vcmask 1041409  }
 0xb6b   : > { %3382 = vmatpush3.bf16.msra.mxu0 %v3684_v24  ;;  %3397 = vmatprep.mubr.msk.bf16.mxu0 %vm3898_vm4, %v3897_v25  ;;  %v3693_v33 = vld [vmem:[#allocation9 + $0x30] sm:$0xff]   ;;  %v3694_v38 = vld [vmem:[#allocation9 + $0x28] sm:$0xff]   ;;  %v3689_v39 = vld [vmem:[%s4752_s18 + $0x10] sm:$0xff]   ;;  %v2628_v29 = vunpack.c.l.b16 %v2601_v37  ;;  %v2627_v20 = vunpack.c.l.b16 %v2600_v42 }
 0xb6c   : > { %3383 = vmatprep.subr.bf16.mxu0 %v3897_v25  ;;  %3417 = vmatprep.mubr.msk.bf16.mxu1 %vm3898_vm4, %v3897_v25  ;;  %v3695_v18 = vld [vmem:[#allocation9 + $0x20] sm:$0xff]   ;;  %v3690_v50 = vld [vmem:[%s4752_s18 + $0x8] sm:$0xff]   ;;  %v3691_v51 = vld [vmem:[%s4752_s18] sm:$0xff]  }
 0xb6d   : > { %3402 = vmatpush3.bf16.msra.mxu1 %v3692_v31  ;;  %v2629_v22 = vrot.slane %v2628_v29, 7  ;;  %v3696_v43 = vld [vmem:[#allocation9 + $0x18] sm:$0xff]   ;;  %v3697_v27 = vld [vmem:[#allocation9 + $0x10] sm:$0xff]   ;;  %v3698_v28 = vld [vmem:[#allocation9 + $0x8] sm:$0xff]  }
 0xb6e   : > { %3403 = vmatprep.subr.bf16.mxu1 %v3897_v25  ;;  %v3699_v13 = vld [vmem:[#allocation9] sm:$0xff]   ;;  %v3172_v14 = vld [vmem:[%s4753_s4] ss:$0 sm:$0xff] }
 0xb6f   : > { %3384 = vmatpush3.bf16.msra.mxu0 %v3685_v26  ;;  %v2631_v44 = vsel %vm2630_vm5, %v2629_v22, %v2627_v20  ;;  %v3181_v49 = vld [vmem:[%s4754_s27] ss:$0 sm:$0xff] }
 0xb70   : > { %3385 = vmatprep.subr.bf16.mxu0 %v3897_v25  ;;  %v2632_v21 = vpack.c.b16 %v2631_v44, %v2631_v44 }
 0xb71   : > { %3404 = vmatpush3.bf16.msra.mxu1 %v3693_v33 }
 0xb72   : > { %3405 = vmatprep.subr.bf16.mxu1 %v3897_v25 }
 0xb73   : > { %3386 = vmatpush3.bf16.msra.mxu0 %v3686_v30 }
 0xb74   : > { %3387 = vmatprep.subr.bf16.mxu0 %v3897_v25 }
 0xb75   : > { %3406 = vmatpush3.bf16.msra.mxu1 %v3694_v38 }
 0xb76   : > { %3407 = vmatprep.subr.bf16.mxu1 %v3897_v25 }
 0xb77   : > { %3388 = vmatpush3.bf16.msra.mxu0 %v3687_v32 }
 0xb78   : > { %3389 = vmatprep.subr.bf16.mxu0 %v3897_v25 }
 0xb79   : > { %3408 = vmatpush3.bf16.msra.mxu1 %v3695_v18 }
 0xb7a   : > { %3409 = vmatprep.subr.bf16.mxu1 %v3897_v25 }
 0xb7b   : > { %3390 = vmatpush3.bf16.msra.mxu0 %v3688_v34 }
 0xb7c   : > { %3391 = vmatprep.subr.bf16.mxu0 %v3897_v25 }
 0xb7d   : > { %3410 = vmatpush3.bf16.msra.mxu1 %v3696_v43 }
 0xb7e   : > { %3411 = vmatprep.subr.bf16.mxu1 %v3897_v25 }
 0xb7f   : > { %3392 = vmatpush3.bf16.msra.mxu0 %v3689_v39 }
 0xb80   : > { %3393 = vmatprep.subr.bf16.mxu0 %v3897_v25 }
 0xb81   : > { %3412 = vmatpush3.bf16.msra.mxu1 %v3697_v27 }
 0xb82   : > { %3413 = vmatprep.subr.bf16.mxu1 %v3897_v25 }
 0xb83   : > { %3394 = vmatpush3.bf16.msra.mxu0 %v3690_v50 }
 0xb84   : > { %3395 = vmatprep.subr.bf16.mxu0 %v3897_v25 }
 0xb85   : > { %3414 = vmatpush3.bf16.msra.mxu1 %v3698_v28 }
 0xb86   : > { %3415 = vmatprep.subr.bf16.mxu1 %v3897_v25 }
 0xb87   : > { %3396 = vmatpush3.bf16.msra.mxu0 %v3691_v51 }
 0xb89   : > { %3416 = vmatpush3.bf16.msra.mxu1 %v3699_v13 }
 0xb8a   : > { %3398 = vmatmul.mubr.bf16.vlgmr.msra.gmra.mxu0 %v2632_v21 }
 0xc4a   : > { %v2716_v40 = vpop.f32.mrf.mxu0 }
 0xc4b   : > { %v2717_v41 = vadd.f32 %v3172_v14, %v2716_v40 }
 0xc4c   : > { %v3399_v45 = vpop.f32.mrf.mxu0 }
 0xc4d   : > { %v2722_v15 = vmax.f32 %v2717_v41, 0.0 }
 0xc4e   : > { %v2719_v46 = vpop.f32.mrf.mxu0 }
 0xc4f   : > { %v2723_v47 = vpack.c.bf16 %v2722_v15, %v2722_v15 }
 0xc50   : > { %v3400_v48 = vpop.f32.mrf.mxu0 }
 0xc51   : > { %3418 = vmatmul.mubr.bf16.vlgmr.msra.gmra.mxu1 %v2723_v47 }
 0xd11   : > { %v2829_v52 = vpop.f32.mrf.mxu1 }
 0xd12   : > { %v2830_v53 = vadd.f32 %v3181_v49, %v2829_v52 }
 0xd13   : > { %v3419_v54 = vpop.f32.mrf.mxu1 }
 0xd14   : > { %2835 = vst [vmem:[#allocation11] sm:$0x3] %v2830_v53 }
 0xd15   : > { %v2832_v55 = vpop.f32.mrf.mxu1 }
 0xd17   : > { %v3420_v56 = vpop.f32.mrf.mxu1 }
 0xd18 PF: > { %p3456_p11 = scmp.eq.s32.totalorder %s4100_s17, 1  ;;  %s3899_s0 = smov [#allocation11]  }
 0xd19   : > { %s2843_s20 = sshll.u32 %s3899_s0, 4  ;;  %s2844_s20 = int_to_ptr.vmem [resolvable:$true] %s2843_s20 }
 0xd1a   : > { %s3810_s9 = scalar_lea.vmem %s2844_s20, 32  ;;  %p3817_p4 = scmp.lt.s32.totalorder %s2844_s20, %s2844_s20 }
 0xd1b   : > { %p3811_p12 = scmp.ne.s32.totalorder %s2844_s20, %s3810_s9  ;;  %p3818_p6 = scmp.lt.s32.totalorder %s3810_s9, %s3810_s9 }
 0xd1d   : > { %p3812_p2 = pnand %p3811_p12, %p3456_p11  ;;  %p3819_p8 = por %p3818_p6, %p3817_p4 }
 0xd1f   : > { %p3813_p13 = pneg %p3812_p2 }
 0xd21   : > { %p3820_p7 = pnand %p3819_p8, %p3813_p13 }
 0xd23   : > { %3823 = shalt.err (!%p3820_p7)
}
 0xd24   : > { %s4755_s1 = sld [smem:[#allocation38_spill]] }
 0xd2a   : > { %3436 = dma.vmem_to_hbm [thread:$0]  (%p3456_p11), %s2844_s20, 32, %s4755_s1, [#allocation5]  }
 0xd2b   : > { %3863 = dma.done.wait (%p3456_p11), [#allocation5], 32  }
 0xd2c   : > { %3865 = vsyncadd (%p3456_p11), [#allocation5], 4294967264 }
 0xd2d PF: > { %s4756_s24 = sld [smem:[#allocation17_spill]]  ;;  %s4759_s1 = smov %s3872_s22 }
 0xd2e   : > { %s4757_s6 = sld [smem:[#allocation16_spill]] }
 0xd2f   : > { %s4758_s23 = sld [smem:[#allocation18_spill]] }
 0xd33   : > { %p35_p10 = scmp.ge.s32.totalorder %s4756_s24, 4  }
 0xd34   : > { %s4760_s22 = smov %s4757_s6 }
 0xd35   :  { %37 = sbr.rel (!%p35_p10) target bundleno = 28 (0x1c), region = 200 }
 0xd3a   :  { %2856 = vsyncpa [#allocation4], 1 }
 0xd3b   :  { %2858 = vsyncpa [#allocation4 + $0x1], 1 }
 0xd3c   :  { %2859 = vsyncpa [#allocation7], 1 }
 0xd3d   :  { %2861 = vsyncpa [#allocation7 + $0x1], 1 }
 0xd3e   :  { %2862 = vsyncpa [#allocation10], 1 }
 0xd3f   :  { %2863 = vsyncpa [#allocation5], 1 }
 0xd40   :  { %2865 = vsyncpa [#allocation5 + $0x1], 1 }

</bundles_post_ra>
